<compile_context>
chip_gen: v7x
topology: tpu7x:2x2x1
jax: 0.10.0
libtpu: 0.0.40
codegen_flags: <defaults>
</compile_context>

<pallas_src>
import functools

import jax
import jax.numpy as jnp
from jax.experimental import pallas as pl
from jax.experimental.pallas import tpu as pltpu


# -----------------------------------------------------------------------------
# VMEM-budget helpers.
# -----------------------------------------------------------------------------
def _vmem_capacity_bytes():
    """Per-core VMEM capacity; conservative 64 MiB (v7x) fallback."""
    try:
        return int(pltpu.get_tpu_info().vmem_capacity_bytes)
    except Exception:
        return 64 * 1024 * 1024


def _pick_spectral_tiles(B, Cin, Cout, Mpad, budget_bytes):
    """Pick (co_blk, m_blk) so that the double-buffered pipeline buffers of
    kernel 1 fit in `budget_bytes`.  co_blk is a multiple-of-8 divisor of Cout
    (or Cout itself); m_blk is a multiple-of-128 divisor of Mpad."""
    co_cands = sorted({c for c in range(8, Cout + 1, 8) if Cout % c == 0} | {Cout},
                      reverse=True)
    m_cands = sorted({m for m in range(128, Mpad + 1, 128) if Mpad % m == 0},
                     reverse=True)

    def bytes_per_step(co_blk, m_blk):
        x_b = B * 4 * Cin * m_blk * 4
        w_b = 4 * Cin * co_blk * m_blk * 4
        o_b = B * 4 * co_blk * m_blk * 4
        return 2 * (x_b + w_b + o_b)          # double-buffered in/out streams

    for m_blk in m_cands:                     # prefer the longest lane runs
        for co_blk in co_cands:
            if bytes_per_step(co_blk, m_blk) <= budget_bytes:
                return co_blk, m_blk
    return co_cands[-1], m_cands[-1]          # smallest legal tiles


def _pick_hw_tile(ICin, ICout, HWpad, budget_bytes, cap=8192):
    """Largest multiple-of-128 divisor of HWpad (<= cap) whose double-buffered
    kernel-2 streams fit the budget.  HWpad is always a multiple of 128."""
    cands = sorted({t for t in range(128, min(HWpad, cap) + 1, 128)
                    if HWpad % t == 0}, reverse=True)
    for t in cands:
        if 2 * (ICin + 2 * ICout) * t * 4 <= budget_bytes:
            return t
    return cands[-1]


# -----------------------------------------------------------------------------
# Kernel 1: per-mode Clifford geometric product on the retained Fourier modes.
# Raw weight blades are streamed; the 16 signed combinations of the Cl(g0,g1)
# kernel matrix are formed in-register.  Batch is folded into the block.
#   x_ref : (B, 4, Cin, m_blk)
#   w_ref : (4, Cin, co_blk, m_blk)
#   o_ref : (B, 4, co_blk, m_blk)
# -----------------------------------------------------------------------------
def _make_spectral_gp_kernel(g0, g1, ci_chunk):
    # Geometric-product table (matches get_2d_clifford_kernel column structure):
    # output blade bo = sum_bi sign * (weight blade wk, contracted over Cin) * x blade bi
    table = (
        ((0, 1.0), (1, g0), (2, g1), (3, -g0 * g1)),   # scalar
        ((1, 1.0), (0, 1.0), (3, -g1), (2, g1)),       # e1
        ((2, 1.0), (3, g0), (0, 1.0), (1, -g0)),       # e2
        ((3, 1.0), (2, 1.0), (1, -1.0), (0, 1.0)),     # e12
    )

    def kernel(x_ref, w_ref, o_ref):
        B = x_ref.shape[0]
        Cin = x_ref.shape[2]
        co_blk, m_blk = o_ref.shape[2], o_ref.shape[3]
        nchunks = Cin // ci_chunk
        for b in range(B):                       # static unroll over batch
            for bo in range(4):                  # static unroll over output blades
                acc = jnp.zeros((co_blk, m_blk), jnp.float32)
                # Chunked Cin accumulation: broadcast temporary is only
                # (ci_chunk, co_blk, m_blk), never (Cin, co_blk, m_blk).
                for c in range(nchunks):         # static unroll (== fori_loop(unroll=True))
                    lo, hi = c * ci_chunk, (c + 1) * ci_chunk
                    contrib = None
                    for bi in range(4):
                        wk, s = table[bo][bi]
                        w = w_ref[wk, lo:hi, :, :]          # (ci_chunk, co_blk, m_blk)
                        xv = x_ref[b, bi, lo:hi, :]         # (ci_chunk, m_blk)
                        t = w * xv[:, None, :]
                        if s != 1.0:                        # static sign/metric factor
                            t = s * t
                        contrib = t if contrib is None else contrib + t
                    acc = acc + jnp.sum(contrib, axis=0)
                o_ref[b, bo, :, :] = acc
    return kernel


def spectral_geometric_product(x_modes, w_raw, *, g0, g1, co_blk, m_blk, ci_chunk,
                               vmem_limit_bytes):
    B, _, Cin, Mpad = x_modes.shape
    Cout = w_raw.shape[2]
    grid = (Cout // co_blk, Mpad // m_blk)       # B folded in: weight streamed once
    kernel = _make_spectral_gp_kernel(g0, g1, ci_chunk)
    return pl.pallas_call(
        kernel,
        out_shape=jax.ShapeDtypeStruct((B, 4, Cout, Mpad), jnp.float32),
        grid=grid,
        in_specs=[
            pl.BlockSpec((B, 4, Cin, m_blk), lambda co, mj: (0, 0, 0, mj)),
            pl.BlockSpec((4, Cin, co_blk, m_blk), lambda co, mj: (0, 0, co, mj)),
        ],
        out_specs=pl.BlockSpec((B, 4, co_blk, m_blk), lambda co, mj: (0, 0, co, mj)),
        compiler_params=pltpu.CompilerParams(
            dimension_semantics=("parallel", "parallel"),
            vmem_limit_bytes=vmem_limit_bytes),
    )(x_modes, w_raw)


# -----------------------------------------------------------------------------
# Kernel 2: fused 1x1 Clifford conv (expanded kernel matrix K) + bias +
# residual add of the Fourier branch + exact erf GELU.  HW tiled on lanes.
#   x_ref  : (1, 4*Cin, t_hw)
#   k_ref  : (4*Cout, 4*Cin)
#   b_ref  : (4*Cout, 1)
#   xf_ref : (1, 4*Cout, t_hw)
#   o_ref  : (1, 4*Cout, t_hw)
# -----------------------------------------------------------------------------
def _conv_add_gelu_kernel(x_ref, k_ref, b_ref, xf_ref, o_ref, *, precision):
    y = jnp.dot(k_ref[...], x_ref[0],
                preferred_element_type=jnp.float32, precision=precision)
    y = y + b_ref[...] + xf_ref[0]
    # exact (erf-based) GELU, matching torch.nn.functional.gelu default.
    o_ref[0] = 0.5 * y * (1.0 + jax.lax.erf(y * 0.7071067811865476))


def conv_add_gelu(x_flat, K, bias, x1_flat, *, t_hw, vmem_limit_bytes):
    B, ICin, HWpad = x_flat.shape
    ICout = K.shape[0]
    grid = (B, HWpad // t_hw)
    # HIGHEST is free on v6e/v7x; on v5e a deep (>=128) contraction in f32
    # emulation can eat the pipelining slack, so fall back to DEFAULT there.
    precision = (jax.lax.Precision.HIGHEST if ICin < 128
                 else jax.lax.Precision.DEFAULT)
    kernel = functools.partial(_conv_add_gelu_kernel, precision=precision)
    return pl.pallas_call(
        kernel,
        out_shape=jax.ShapeDtypeStruct((B, ICout, HWpad), jnp.float32),
        grid=grid,
        in_specs=[
            pl.BlockSpec((1, ICin, t_hw), lambda b, j: (b, 0, j)),
            pl.BlockSpec((ICout, ICin), lambda b, j: (0, 0)),
            pl.BlockSpec((ICout, 1), lambda b, j: (0, 0)),
            pl.BlockSpec((1, ICout, t_hw), lambda b, j: (b, 0, j)),
        ],
        out_specs=pl.BlockSpec((1, ICout, t_hw), lambda b, j: (b, 0, j)),
        compiler_params=pltpu.CompilerParams(
            dimension_semantics=("parallel", "parallel"),
            vmem_limit_bytes=vmem_limit_bytes),
    )(x_flat, K, bias, x1_flat)


# -----------------------------------------------------------------------------
# Full block forward.
# -----------------------------------------------------------------------------
def clifford_fourier_basic_block_2d(x, params, *, g=(1.0, 1.0), modes1=4, modes2=4,
                                    blade_major_output=False):
    # x: (B, Cin, H, W, 4) float32 multivector field, blades [1, e1, e2, e12].
    B, Cin, H, W, I = x.shape
    assert I == 4, "2D Clifford algebra has 4 blades."
    assert 2 * modes1 <= H and 2 * modes2 <= W, "mode crop exceeds spatial size"
    w_spec = params["spectral_weights"].astype(jnp.float32)   # (4, Cin, Cout, 2m1, 2m2)
    conv_w = params["conv_weights"].astype(jnp.float32)       # (4, Cout, Cin)
    conv_b = params["conv_bias"].astype(jnp.float32)          # (4, Cout)
    Cout = conv_w.shape[1]
    g0, g1 = float(g[0]), float(g[1])
    HW = H * W

    capacity = _vmem_capacity_bytes()
    budget = int(0.40 * capacity)              # pipeline-buffer budget per kernel
    vmem_limit = int(0.85 * capacity)

    # Single transpose to the internal canonical layout (B, blade, C, H, W),
    # reused by both the Fourier and the conv branch.
    x_t = jnp.transpose(x, (0, 4, 1, 2, 3)).astype(jnp.float32)      # (B, 4, Cin, H, W)

    # ---------------- Fourier branch: CliffordSpectralConv2d ----------------
    d1 = x_t[:, 0] + 1j * x_t[:, 3]                                   # (1, e12) pair
    d2 = x_t[:, 1] + 1j * x_t[:, 2]                                   # (e1, e2) pair
    # TODO(synk): FFT / fftshift have no Pallas primitive; kept in plain JAX.
    d1f = jnp.fft.fftshift(jnp.fft.fft2(d1, axes=(-2, -1)), axes=(-2, -1))
    d2f = jnp.fft.fftshift(jnp.fft.fft2(d2, axes=(-2, -1)), axes=(-2, -1))

    c1, c2 = H // 2, W // 2
    s1 = slice(c1 - modes1, c1 + modes1)
    s2 = slice(c2 - modes2, c2 + modes2)
    M = (2 * modes1) * (2 * modes2)

    # real multivector Fourier coefficients, cropped, blade-major.
    x_ft = jnp.stack([jnp.real(d1f), jnp.real(d2f),
                      jnp.imag(d2f), jnp.imag(d1f)], axis=1)          # (B, 4, Cin, H, W)
    x_modes = x_ft[:, :, :, s1, s2].reshape(B, 4, Cin, M)             # (B, 4, Cin, M)

    # Raw per-mode weight blades (no 4x sign-expansion; combined in-kernel).
    w_raw = w_spec.reshape(4, Cin, Cout, M)                           # (4, Cin, Cout, M)

    # Pad the mode axis to a lane-dense multiple of 128 (zeros -> zero output).
    Mpad = ((M + 127) // 128) * 128
    if Mpad != M:
        x_modes = jnp.pad(x_modes, ((0, 0), (0, 0), (0, 0), (0, Mpad - M)))
        w_raw = jnp.pad(w_raw, ((0, 0), (0, 0), (0, 0), (0, Mpad - M)))

    co_blk, m_blk = _pick_spectral_tiles(B, Cin, Cout, Mpad, budget)
    ci_chunk = max(d for d in range(1, min(8, Cin) + 1) if Cin % d == 0)
    out_modes = spectral_geometric_product(
        x_modes, w_raw, g0=g0, g1=g1, co_blk=co_blk, m_blk=m_blk,
        ci_chunk=ci_chunk, vmem_limit_bytes=vmem_limit)               # (B, 4, Cout, Mpad)

    out_ft_c = out_modes[:, :, :, :M].reshape(B, 4, Cout, 2 * modes1, 2 * modes2)
    out_ft = jnp.zeros((B, 4, Cout, H, W), jnp.float32)
    out_ft = out_ft.at[:, :, :, s1, s2].set(out_ft_c)

    od1f = out_ft[:, 0] + 1j * out_ft[:, 3]
    od2f = out_ft[:, 1] + 1j * out_ft[:, 2]
    od1 = jnp.fft.ifft2(jnp.fft.ifftshift(od1f, axes=(-2, -1)), axes=(-2, -1))
    od2 = jnp.fft.ifft2(jnp.fft.ifftshift(od2f, axes=(-2, -1)), axes=(-2, -1))
    # Build x1 directly blade-major (B, 4, Cout, H, W): no extra HBM transpose.
    x1 = jnp.stack([jnp.real(od1), jnp.real(od2),
                    jnp.imag(od2), jnp.imag(od1)], axis=1).astype(jnp.float32)

    # ------------- conv branch (1x1 Clifford conv) + add + GELU -------------
    w0c, w1c, w2c, w3c = conv_w[0], conv_w[1], conv_w[2], conv_w[3]   # (Cout, Cin)
    k0 = jnp.concatenate([w0c, g0 * w1c, g1 * w2c, -g0 * g1 * w3c], axis=1)
    k1 = jnp.concatenate([w1c, w0c, -g1 * w3c, g1 * w2c], axis=1)
    k2 = jnp.concatenate([w2c, g0 * w3c, w0c, -g0 * w1c], axis=1)
    k3 = jnp.concatenate([w3c, w2c, -w1c, w0c], axis=1)
    K = jnp.concatenate([k0, k1, k2, k3], axis=0)                     # (4*Cout, 4*Cin)
    bias_flat = conv_b.reshape(4 * Cout, 1)

    x_flat = x_t.reshape(B, 4 * Cin, HW)                              # blade-major channels
    x1_flat = x1.reshape(B, 4 * Cout, HW)

    # Pad HW to a multiple of 128 so every store is lane-dense and the tile is
    # never forced to the (possibly huge, un-pipelined) full extent.
    HWpad = ((HW + 127) // 128) * 128
    if HWpad != HW:
        x_flat = jnp.pad(x_flat, ((0, 0), (0, 0), (0, HWpad - HW)))
        x1_flat = jnp.pad(x1_flat, ((0, 0), (0, 0), (0, HWpad - HW)))

    t_hw = _pick_hw_tile(4 * Cin, 4 * Cout, HWpad, budget)
    out_flat = conv_add_gelu(x_flat, K, bias_flat, x1_flat,
                             t_hw=t_hw, vmem_limit_bytes=vmem_limit)  # (B, 4*Cout, HWpad)

    out = out_flat[:, :, :HW].reshape(B, 4, Cout, H, W)
    if blade_major_output:
        return out                                                    # (B, 4, Cout, H, W)
    # TODO(synk): if the downstream consumer accepts blade-major activations,
    # call with blade_major_output=True and drop this full-tensor transpose.
    return jnp.transpose(out, (0, 2, 3, 4, 1))                        # (B, Cout, H, W, 4)


if __name__ == "__main__":
    key = jax.random.PRNGKey(0)
    B, Cin, Cout, H, W = 2, 4, 4, 16, 16
    modes1 = modes2 = 4
    g = (1.0, 1.0)   # Clifford algebra signature

    k_x, k_ws, k_w0, k_w1, k_w2, k_w3, k_b = jax.random.split(key, 7)
    x = jax.random.normal(k_x, (B, Cin, H, W, 4), jnp.float32)

    # Deterministic synthetic parameters (shapes match the torch module's __init__).
    scale = 1.0 / (Cin * Cout)
    spectral_weights = scale * jax.random.uniform(
        k_ws, (4, Cin, Cout, 2 * modes1, 2 * modes2), jnp.float32)
    conv_weights = jnp.stack(
        [0.1 * jax.random.normal(k, (Cout, Cin), jnp.float32)
         for k in (k_w0, k_w1, k_w2, k_w3)], axis=0)                  # (4, Cout, Cin)
    conv_bias = 0.01 * jax.random.normal(k_b, (4, Cout), jnp.float32)

    params = {
        "spectral_weights": spectral_weights,
        "conv_weights": conv_weights,
        "conv_bias": conv_bias,
    }

    out = clifford_fourier_basic_block_2d(x, params, g=g,
                                          modes1=modes1, modes2=modes2)
    out = jax.block_until_ready(out)
    assert out.shape == (B, Cout, H, W, 4)
    assert jnp.all(jnp.isfinite(out))
    print("KERNEL_OK")
</pallas_src>

<mosaic_0001>
module attributes {stable_mosaic.version = 11 : i64} {
  func.func @kernel(%arg0: i32, %arg1: i32, %arg2: memref<2x4x4x128xf32, #tpu.memory_space<vmem>>, %arg3: memref<4x4x4x128xf32, #tpu.memory_space<vmem>>, %arg4: memref<2x4x4x128xf32, #tpu.memory_space<vmem>>) attributes {dimension_semantics = [#tpu.dimension_semantics<parallel>, #tpu.dimension_semantics<parallel>], iteration_bounds = array<i64: 1, 1>, scalar_prefetch = 0 : i64, scratch_operands = 0 : i64, tpu.core_type = #tpu.core_type<tc>, window_params = [{transform_indices = @transform_0, window_bounds = array<i64: 2, 4, 4, 128>}, {transform_indices = @transform_1, window_bounds = array<i64: 4, 4, 4, 128>}, {transform_indices = @transform_2, window_bounds = array<i64: 2, 4, 4, 128>}]} {
    %cst = arith.constant 0.000000e+00 : f32
    %0 = vector.broadcast %cst : f32 to vector<4x128xf32>
    %c0 = arith.constant 0 : index
    %c0_0 = arith.constant 0 : index
    %c0_1 = arith.constant 0 : index
    %c0_2 = arith.constant 0 : index
    %1 = vector.load %arg3[%c0, %c0_0, %c0_1, %c0_2] : memref<4x4x4x128xf32, #tpu.memory_space<vmem>>, vector<1x4x4x128xf32>
    %2 = vector.shape_cast %1 : vector<1x4x4x128xf32> to vector<4x4x128xf32>
    %c0_3 = arith.constant 0 : index
    %c0_4 = arith.constant 0 : index
    %c0_5 = arith.constant 0 : index
    %c0_6 = arith.constant 0 : index
    %3 = vector.load %arg2[%c0_3, %c0_4, %c0_5, %c0_6] : memref<2x4x4x128xf32, #tpu.memory_space<vmem>>, vector<1x1x4x128xf32>
    %4 = vector.shape_cast %3 : vector<1x1x4x128xf32> to vector<4x128xf32>
    %5 = vector.shape_cast %4 : vector<4x128xf32> to vector<4x1x128xf32>
    %6 = vector.broadcast %5 : vector<4x1x128xf32> to vector<4x4x128xf32>
    %7 = arith.mulf %2, %6 : vector<4x4x128xf32>
    %c1 = arith.constant 1 : index
    %c0_7 = arith.constant 0 : index
    %c0_8 = arith.constant 0 : index
    %c0_9 = arith.constant 0 : index
    %8 = vector.load %arg3[%c1, %c0_7, %c0_8, %c0_9] : memref<4x4x4x128xf32, #tpu.memory_space<vmem>>, vector<1x4x4x128xf32>
    %9 = vector.shape_cast %8 : vector<1x4x4x128xf32> to vector<4x4x128xf32>
    %c0_10 = arith.constant 0 : index
    %c1_11 = arith.constant 1 : index
    %c0_12 = arith.constant 0 : index
    %c0_13 = arith.constant 0 : index
    %10 = vector.load %arg2[%c0_10, %c1_11, %c0_12, %c0_13] : memref<2x4x4x128xf32, #tpu.memory_space<vmem>>, vector<1x1x4x128xf32>
    %11 = vector.shape_cast %10 : vector<1x1x4x128xf32> to vector<4x128xf32>
    %12 = vector.shape_cast %11 : vector<4x128xf32> to vector<4x1x128xf32>
    %13 = vector.broadcast %12 : vector<4x1x128xf32> to vector<4x4x128xf32>
    %14 = arith.mulf %9, %13 : vector<4x4x128xf32>
    %15 = arith.addf %7, %14 : vector<4x4x128xf32>
    %c2 = arith.constant 2 : index
    %c0_14 = arith.constant 0 : index
    %c0_15 = arith.constant 0 : index
    %c0_16 = arith.constant 0 : index
    %16 = vector.load %arg3[%c2, %c0_14, %c0_15, %c0_16] : memref<4x4x4x128xf32, #tpu.memory_space<vmem>>, vector<1x4x4x128xf32>
    %17 = vector.shape_cast %16 : vector<1x4x4x128xf32> to vector<4x4x128xf32>
    %c0_17 = arith.constant 0 : index
    %c2_18 = arith.constant 2 : index
    %c0_19 = arith.constant 0 : index
    %c0_20 = arith.constant 0 : index
    %18 = vector.load %arg2[%c0_17, %c2_18, %c0_19, %c0_20] : memref<2x4x4x128xf32, #tpu.memory_space<vmem>>, vector<1x1x4x128xf32>
    %19 = vector.shape_cast %18 : vector<1x1x4x128xf32> to vector<4x128xf32>
    %20 = vector.shape_cast %19 : vector<4x128xf32> to vector<4x1x128xf32>
    %21 = vector.broadcast %20 : vector<4x1x128xf32> to vector<4x4x128xf32>
    %22 = arith.mulf %17, %21 : vector<4x4x128xf32>
    %23 = arith.addf %15, %22 : vector<4x4x128xf32>
    %c3 = arith.constant 3 : index
    %c0_21 = arith.constant 0 : index
    %c0_22 = arith.constant 0 : index
    %c0_23 = arith.constant 0 : index
    %24 = vector.load %arg3[%c3, %c0_21, %c0_22, %c0_23] : memref<4x4x4x128xf32, #tpu.memory_space<vmem>>, vector<1x4x4x128xf32>
    %25 = vector.shape_cast %24 : vector<1x4x4x128xf32> to vector<4x4x128xf32>
    %c0_24 = arith.constant 0 : index
    %c3_25 = arith.constant 3 : index
    %c0_26 = arith.constant 0 : index
    %c0_27 = arith.constant 0 : index
    %26 = vector.load %arg2[%c0_24, %c3_25, %c0_26, %c0_27] : memref<2x4x4x128xf32, #tpu.memory_space<vmem>>, vector<1x1x4x128xf32>
    %27 = vector.shape_cast %26 : vector<1x1x4x128xf32> to vector<4x128xf32>
    %28 = vector.shape_cast %27 : vector<4x128xf32> to vector<4x1x128xf32>
    %29 = vector.broadcast %28 : vector<4x1x128xf32> to vector<4x4x128xf32>
    %30 = arith.mulf %25, %29 : vector<4x4x128xf32>
    %cst_28 = arith.constant -1.000000e+00 : f32
    %31 = vector.broadcast %cst_28 : f32 to vector<4x4x128xf32>
    %32 = arith.mulf %31, %30 : vector<4x4x128xf32>
    %33 = arith.addf %23, %32 : vector<4x4x128xf32>
    %cst_29 = arith.constant dense<0.000000e+00> : vector<4x128xf32>
    %34 = vector.multi_reduction <add>, %33, %cst_29 [0] : vector<4x4x128xf32> to vector<4x128xf32>
    %35 = arith.addf %0, %34 : vector<4x128xf32>
    %c0_30 = arith.constant 0 : index
    %c0_31 = arith.constant 0 : index
    %c0_32 = arith.constant 0 : index
    %c0_33 = arith.constant 0 : index
    %36 = vector.load %arg4[%c0_30, %c0_31, %c0_32, %c0_33] : memref<2x4x4x128xf32, #tpu.memory_space<vmem>>, vector<1x1x4x128xf32>
    %37 = vector.shape_cast %36 : vector<1x1x4x128xf32> to vector<4x128xf32>
    %38 = vector.shape_cast %35 : vector<4x128xf32> to vector<1x1x4x128xf32>
    tpu.vector_store %arg4[%c0_30, %c0_31, %c0_32, %c0_33], %38 {strides = array<i32>} : memref<2x4x4x128xf32, #tpu.memory_space<vmem>>, vector<1x1x4x128xf32>,
    %cst_34 = arith.constant 0.000000e+00 : f32
    %39 = vector.broadcast %cst_34 : f32 to vector<4x128xf32>
    %c1_35 = arith.constant 1 : index
    %c0_36 = arith.constant 0 : index
    %c0_37 = arith.constant 0 : index
    %c0_38 = arith.constant 0 : index
    %40 = vector.load %arg3[%c1_35, %c0_36, %c0_37, %c0_38] : memref<4x4x4x128xf32, #tpu.memory_space<vmem>>, vector<1x4x4x128xf32>
    %41 = vector.shape_cast %40 : vector<1x4x4x128xf32> to vector<4x4x128xf32>
    %c0_39 = arith.constant 0 : index
    %c0_40 = arith.constant 0 : index
    %c0_41 = arith.constant 0 : index
    %c0_42 = arith.constant 0 : index
    %42 = vector.load %arg2[%c0_39, %c0_40, %c0_41, %c0_42] : memref<2x4x4x128xf32, #tpu.memory_space<vmem>>, vector<1x1x4x128xf32>
    %43 = vector.shape_cast %42 : vector<1x1x4x128xf32> to vector<4x128xf32>
    %44 = vector.shape_cast %43 : vector<4x128xf32> to vector<4x1x128xf32>
    %45 = vector.broadcast %44 : vector<4x1x128xf32> to vector<4x4x128xf32>
    %46 = arith.mulf %41, %45 : vector<4x4x128xf32>
    %c0_43 = arith.constant 0 : index
    %c0_44 = arith.constant 0 : index
    %c0_45 = arith.constant 0 : index
    %c0_46 = arith.constant 0 : index
    %47 = vector.load %arg3[%c0_43, %c0_44, %c0_45, %c0_46] : memref<4x4x4x128xf32, #tpu.memory_space<vmem>>, vector<1x4x4x128xf32>
    %48 = vector.shape_cast %47 : vector<1x4x4x128xf32> to vector<4x4x128xf32>
    %c0_47 = arith.constant 0 : index
    %c1_48 = arith.constant 1 : index
    %c0_49 = arith.constant 0 : index
    %c0_50 = arith.constant 0 : index
    %49 = vector.load %arg2[%c0_47, %c1_48, %c0_49, %c0_50] : memref<2x4x4x128xf32, #tpu.memory_space<vmem>>, vector<1x1x4x128xf32>
    %50 = vector.shape_cast %49 : vector<1x1x4x128xf32> to vector<4x128xf32>
    %51 = vector.shape_cast %50 : vector<4x128xf32> to vector<4x1x128xf32>
    %52 = vector.broadcast %51 : vector<4x1x128xf32> to vector<4x4x128xf32>
    %53 = arith.mulf %48, %52 : vector<4x4x128xf32>
    %54 = arith.addf %46, %53 : vector<4x4x128xf32>
    %c3_51 = arith.constant 3 : index
    %c0_52 = arith.constant 0 : index
    %c0_53 = arith.constant 0 : index
    %c0_54 = arith.constant 0 : index
    %55 = vector.load %arg3[%c3_51, %c0_52, %c0_53, %c0_54] : memref<4x4x4x128xf32, #tpu.memory_space<vmem>>, vector<1x4x4x128xf32>
    %56 = vector.shape_cast %55 : vector<1x4x4x128xf32> to vector<4x4x128xf32>
    %c0_55 = arith.constant 0 : index
    %c2_56 = arith.constant 2 : index
    %c0_57 = arith.constant 0 : index
    %c0_58 = arith.constant 0 : index
    %57 = vector.load %arg2[%c0_55, %c2_56, %c0_57, %c0_58] : memref<2x4x4x128xf32, #tpu.memory_space<vmem>>, vector<1x1x4x128xf32>
    %58 = vector.shape_cast %57 : vector<1x1x4x128xf32> to vector<4x128xf32>
    %59 = vector.shape_cast %58 : vector<4x128xf32> to vector<4x1x128xf32>
    %60 = vector.broadcast %59 : vector<4x1x128xf32> to vector<4x4x128xf32>
    %61 = arith.mulf %56, %60 : vector<4x4x128xf32>
    %cst_59 = arith.constant -1.000000e+00 : f32
    %62 = vector.broadcast %cst_59 : f32 to vector<4x4x128xf32>
    %63 = arith.mulf %62, %61 : vector<4x4x128xf32>
    %64 = arith.addf %54, %63 : vector<4x4x128xf32>
    %c2_60 = arith.constant 2 : index
    %c0_61 = arith.constant 0 : index
    %c0_62 = arith.constant 0 : index
    %c0_63 = arith.constant 0 : index
    %65 = vector.load %arg3[%c2_60, %c0_61, %c0_62, %c0_63] : memref<4x4x4x128xf32, #tpu.memory_space<vmem>>, vector<1x4x4x128xf32>
    %66 = vector.shape_cast %65 : vector<1x4x4x128xf32> to vector<4x4x128xf32>
    %c0_64 = arith.constant 0 : index
    %c3_65 = arith.constant 3 : index
    %c0_66 = arith.constant 0 : index
    %c0_67 = arith.constant 0 : index
    %67 = vector.load %arg2[%c0_64, %c3_65, %c0_66, %c0_67] : memref<2x4x4x128xf32, #tpu.memory_space<vmem>>, vector<1x1x4x128xf32>
    %68 = vector.shape_cast %67 : vector<1x1x4x128xf32> to vector<4x128xf32>
    %69 = vector.shape_cast %68 : vector<4x128xf32> to vector<4x1x128xf32>
    %70 = vector.broadcast %69 : vector<4x1x128xf32> to vector<4x4x128xf32>
    %71 = arith.mulf %66, %70 : vector<4x4x128xf32>
    %72 = arith.addf %64, %71 : vector<4x4x128xf32>
    %cst_68 = arith.constant dense<0.000000e+00> : vector<4x128xf32>
    %73 = vector.multi_reduction <add>, %72, %cst_68 [0] : vector<4x4x128xf32> to vector<4x128xf32>
    %74 = arith.addf %39, %73 : vector<4x128xf32>
    %c0_69 = arith.constant 0 : index
    %c1_70 = arith.constant 1 : index
    %c0_71 = arith.constant 0 : index
    %c0_72 = arith.constant 0 : index
    %75 = vector.load %arg4[%c0_69, %c1_70, %c0_71, %c0_72] : memref<2x4x4x128xf32, #tpu.memory_space<vmem>>, vector<1x1x4x128xf32>
    %76 = vector.shape_cast %75 : vector<1x1x4x128xf32> to vector<4x128xf32>
    %77 = vector.shape_cast %74 : vector<4x128xf32> to vector<1x1x4x128xf32>
    tpu.vector_store %arg4[%c0_69, %c1_70, %c0_71, %c0_72], %77 {strides = array<i32>} : memref<2x4x4x128xf32, #tpu.memory_space<vmem>>, vector<1x1x4x128xf32>,
    %cst_73 = arith.constant 0.000000e+00 : f32
    %78 = vector.broadcast %cst_73 : f32 to vector<4x128xf32>
    %c2_74 = arith.constant 2 : index
    %c0_75 = arith.constant 0 : index
    %c0_76 = arith.constant 0 : index
    %c0_77 = arith.constant 0 : index
    %79 = vector.load %arg3[%c2_74, %c0_75, %c0_76, %c0_77] : memref<4x4x4x128xf32, #tpu.memory_space<vmem>>, vector<1x4x4x128xf32>
    %80 = vector.shape_cast %79 : vector<1x4x4x128xf32> to vector<4x4x128xf32>
    %c0_78 = arith.constant 0 : index
    %c0_79 = arith.constant 0 : index
    %c0_80 = arith.constant 0 : index
    %c0_81 = arith.constant 0 : index
    %81 = vector.load %arg2[%c0_78, %c0_79, %c0_80, %c0_81] : memref<2x4x4x128xf32, #tpu.memory_space<vmem>>, vector<1x1x4x128xf32>
    %82 = vector.shape_cast %81 : vector<1x1x4x128xf32> to vector<4x128xf32>
    %83 = vector.shape_cast %82 : vector<4x128xf32> to vector<4x1x128xf32>
    %84 = vector.broadcast %83 : vector<4x1x128xf32> to vector<4x4x128xf32>
    %85 = arith.mulf %80, %84 : vector<4x4x128xf32>
    %c3_82 = arith.constant 3 : index
    %c0_83 = arith.constant 0 : index
    %c0_84 = arith.constant 0 : index
    %c0_85 = arith.constant 0 : index
    %86 = vector.load %arg3[%c3_82, %c0_83, %c0_84, %c0_85] : memref<4x4x4x128xf32, #tpu.memory_space<vmem>>, vector<1x4x4x128xf32>
    %87 = vector.shape_cast %86 : vector<1x4x4x128xf32> to vector<4x4x128xf32>
    %c0_86 = arith.constant 0 : index
    %c1_87 = arith.constant 1 : index
    %c0_88 = arith.constant 0 : index
    %c0_89 = arith.constant 0 : index
    %88 = vector.load %arg2[%c0_86, %c1_87, %c0_88, %c0_89] : memref<2x4x4x128xf32, #tpu.memory_space<vmem>>, vector<1x1x4x128xf32>
    %89 = vector.shape_cast %88 : vector<1x1x4x128xf32> to vector<4x128xf32>
    %90 = vector.shape_cast %89 : vector<4x128xf32> to vector<4x1x128xf32>
    %91 = vector.broadcast %90 : vector<4x1x128xf32> to vector<4x4x128xf32>
    %92 = arith.mulf %87, %91 : vector<4x4x128xf32>
    %93 = arith.addf %85, %92 : vector<4x4x128xf32>
    %c0_90 = arith.constant 0 : index
    %c0_91 = arith.constant 0 : index
    %c0_92 = arith.constant 0 : index
    %c0_93 = arith.constant 0 : index
    %94 = vector.load %arg3[%c0_90, %c0_91, %c0_92, %c0_93] : memref<4x4x4x128xf32, #tpu.memory_space<vmem>>, vector<1x4x4x128xf32>
    %95 = vector.shape_cast %94 : vector<1x4x4x128xf32> to vector<4x4x128xf32>
    %c0_94 = arith.constant 0 : index
    %c2_95 = arith.constant 2 : index
    %c0_96 = arith.constant 0 : index
    %c0_97 = arith.constant 0 : index
    %96 = vector.load %arg2[%c0_94, %c2_95, %c0_96, %c0_97] : memref<2x4x4x128xf32, #tpu.memory_space<vmem>>, vector<1x1x4x128xf32>
    %97 = vector.shape_cast %96 : vector<1x1x4x128xf32> to vector<4x128xf32>
    %98 = vector.shape_cast %97 : vector<4x128xf32> to vector<4x1x128xf32>
    %99 = vector.broadcast %98 : vector<4x1x128xf32> to vector<4x4x128xf32>
    %100 = arith.mulf %95, %99 : vector<4x4x128xf32>
    %101 = arith.addf %93, %100 : vector<4x4x128xf32>
    %c1_98 = arith.constant 1 : index
    %c0_99 = arith.constant 0 : index
    %c0_100 = arith.constant 0 : index
    %c0_101 = arith.constant 0 : index
    %102 = vector.load %arg3[%c1_98, %c0_99, %c0_100, %c0_101] : memref<4x4x4x128xf32, #tpu.memory_space<vmem>>, vector<1x4x4x128xf32>
    %103 = vector.shape_cast %102 : vector<1x4x4x128xf32> to vector<4x4x128xf32>
    %c0_102 = arith.constant 0 : index
    %c3_103 = arith.constant 3 : index
    %c0_104 = arith.constant 0 : index
    %c0_105 = arith.constant 0 : index
    %104 = vector.load %arg2[%c0_102, %c3_103, %c0_104, %c0_105] : memref<2x4x4x128xf32, #tpu.memory_space<vmem>>, vector<1x1x4x128xf32>
    %105 = vector.shape_cast %104 : vector<1x1x4x128xf32> to vector<4x128xf32>
    %106 = vector.shape_cast %105 : vector<4x128xf32> to vector<4x1x128xf32>
    %107 = vector.broadcast %106 : vector<4x1x128xf32> to vector<4x4x128xf32>
    %108 = arith.mulf %103, %107 : vector<4x4x128xf32>
    %cst_106 = arith.constant -1.000000e+00 : f32
    %109 = vector.broadcast %cst_106 : f32 to vector<4x4x128xf32>
    %110 = arith.mulf %109, %108 : vector<4x4x128xf32>
    %111 = arith.addf %101, %110 : vector<4x4x128xf32>
    %cst_107 = arith.constant dense<0.000000e+00> : vector<4x128xf32>
    %112 = vector.multi_reduction <add>, %111, %cst_107 [0] : vector<4x4x128xf32> to vector<4x128xf32>
    %113 = arith.addf %78, %112 : vector<4x128xf32>
    %c0_108 = arith.constant 0 : index
    %c2_109 = arith.constant 2 : index
    %c0_110 = arith.constant 0 : index
    %c0_111 = arith.constant 0 : index
    %114 = vector.load %arg4[%c0_108, %c2_109, %c0_110, %c0_111] : memref<2x4x4x128xf32, #tpu.memory_space<vmem>>, vector<1x1x4x128xf32>
    %115 = vector.shape_cast %114 : vector<1x1x4x128xf32> to vector<4x128xf32>
    %116 = vector.shape_cast %113 : vector<4x128xf32> to vector<1x1x4x128xf32>
    tpu.vector_store %arg4[%c0_108, %c2_109, %c0_110, %c0_111], %116 {strides = array<i32>} : memref<2x4x4x128xf32, #tpu.memory_space<vmem>>, vector<1x1x4x128xf32>,
    %cst_112 = arith.constant 0.000000e+00 : f32
    %117 = vector.broadcast %cst_112 : f32 to vector<4x128xf32>
    %c3_113 = arith.constant 3 : index
    %c0_114 = arith.constant 0 : index
    %c0_115 = arith.constant 0 : index
    %c0_116 = arith.constant 0 : index
    %118 = vector.load %arg3[%c3_113, %c0_114, %c0_115, %c0_116] : memref<4x4x4x128xf32, #tpu.memory_space<vmem>>, vector<1x4x4x128xf32>
    %119 = vector.shape_cast %118 : vector<1x4x4x128xf32> to vector<4x4x128xf32>
    %c0_117 = arith.constant 0 : index
    %c0_118 = arith.constant 0 : index
    %c0_119 = arith.constant 0 : index
    %c0_120 = arith.constant 0 : index
    %120 = vector.load %arg2[%c0_117, %c0_118, %c0_119, %c0_120] : memref<2x4x4x128xf32, #tpu.memory_space<vmem>>, vector<1x1x4x128xf32>
    %121 = vector.shape_cast %120 : vector<1x1x4x128xf32> to vector<4x128xf32>
    %122 = vector.shape_cast %121 : vector<4x128xf32> to vector<4x1x128xf32>
    %123 = vector.broadcast %122 : vector<4x1x128xf32> to vector<4x4x128xf32>
    %124 = arith.mulf %119, %123 : vector<4x4x128xf32>
    %c2_121 = arith.constant 2 : index
    %c0_122 = arith.constant 0 : index
    %c0_123 = arith.constant 0 : index
    %c0_124 = arith.constant 0 : index
    %125 = vector.load %arg3[%c2_121, %c0_122, %c0_123, %c0_124] : memref<4x4x4x128xf32, #tpu.memory_space<vmem>>, vector<1x4x4x128xf32>
    %126 = vector.shape_cast %125 : vector<1x4x4x128xf32> to vector<4x4x128xf32>
    %c0_125 = arith.constant 0 : index
    %c1_126 = arith.constant 1 : index
    %c0_127 = arith.constant 0 : index
    %c0_128 = arith.constant 0 : index
    %127 = vector.load %arg2[%c0_125, %c1_126, %c0_127, %c0_128] : memref<2x4x4x128xf32, #tpu.memory_space<vmem>>, vector<1x1x4x128xf32>
    %128 = vector.shape_cast %127 : vector<1x1x4x128xf32> to vector<4x128xf32>
    %129 = vector.shape_cast %128 : vector<4x128xf32> to vector<4x1x128xf32>
    %130 = vector.broadcast %129 : vector<4x1x128xf32> to vector<4x4x128xf32>
    %131 = arith.mulf %126, %130 : vector<4x4x128xf32>
    %132 = arith.addf %124, %131 : vector<4x4x128xf32>
    %c1_129 = arith.constant 1 : index
    %c0_130 = arith.constant 0 : index
    %c0_131 = arith.constant 0 : index
    %c0_132 = arith.constant 0 : index
    %133 = vector.load %arg3[%c1_129, %c0_130, %c0_131, %c0_132] : memref<4x4x4x128xf32, #tpu.memory_space<vmem>>, vector<1x4x4x128xf32>
    %134 = vector.shape_cast %133 : vector<1x4x4x128xf32> to vector<4x4x128xf32>
    %c0_133 = arith.constant 0 : index
    %c2_134 = arith.constant 2 : index
    %c0_135 = arith.constant 0 : index
    %c0_136 = arith.constant 0 : index
    %135 = vector.load %arg2[%c0_133, %c2_134, %c0_135, %c0_136] : memref<2x4x4x128xf32, #tpu.memory_space<vmem>>, vector<1x1x4x128xf32>
    %136 = vector.shape_cast %135 : vector<1x1x4x128xf32> to vector<4x128xf32>
    %137 = vector.shape_cast %136 : vector<4x128xf32> to vector<4x1x128xf32>
    %138 = vector.broadcast %137 : vector<4x1x128xf32> to vector<4x4x128xf32>
    %139 = arith.mulf %134, %138 : vector<4x4x128xf32>
    %cst_137 = arith.constant -1.000000e+00 : f32
    %140 = vector.broadcast %cst_137 : f32 to vector<4x4x128xf32>
    %141 = arith.mulf %140, %139 : vector<4x4x128xf32>
    %142 = arith.addf %132, %141 : vector<4x4x128xf32>
    %c0_138 = arith.constant 0 : index
    %c0_139 = arith.constant 0 : index
    %c0_140 = arith.constant 0 : index
    %c0_141 = arith.constant 0 : index
    %143 = vector.load %arg3[%c0_138, %c0_139, %c0_140, %c0_141] : memref<4x4x4x128xf32, #tpu.memory_space<vmem>>, vector<1x4x4x128xf32>
    %144 = vector.shape_cast %143 : vector<1x4x4x128xf32> to vector<4x4x128xf32>
    %c0_142 = arith.constant 0 : index
    %c3_143 = arith.constant 3 : index
    %c0_144 = arith.constant 0 : index
    %c0_145 = arith.constant 0 : index
    %145 = vector.load %arg2[%c0_142, %c3_143, %c0_144, %c0_145] : memref<2x4x4x128xf32, #tpu.memory_space<vmem>>, vector<1x1x4x128xf32>
    %146 = vector.shape_cast %145 : vector<1x1x4x128xf32> to vector<4x128xf32>
    %147 = vector.shape_cast %146 : vector<4x128xf32> to vector<4x1x128xf32>
    %148 = vector.broadcast %147 : vector<4x1x128xf32> to vector<4x4x128xf32>
    %149 = arith.mulf %144, %148 : vector<4x4x128xf32>
    %150 = arith.addf %142, %149 : vector<4x4x128xf32>
    %cst_146 = arith.constant dense<0.000000e+00> : vector<4x128xf32>
    %151 = vector.multi_reduction <add>, %150, %cst_146 [0] : vector<4x4x128xf32> to vector<4x128xf32>
    %152 = arith.addf %117, %151 : vector<4x128xf32>
    %c0_147 = arith.constant 0 : index
    %c3_148 = arith.constant 3 : index
    %c0_149 = arith.constant 0 : index
    %c0_150 = arith.constant 0 : index
    %153 = vector.load %arg4[%c0_147, %c3_148, %c0_149, %c0_150] : memref<2x4x4x128xf32, #tpu.memory_space<vmem>>, vector<1x1x4x128xf32>
    %154 = vector.shape_cast %153 : vector<1x1x4x128xf32> to vector<4x128xf32>
    %155 = vector.shape_cast %152 : vector<4x128xf32> to vector<1x1x4x128xf32>
    tpu.vector_store %arg4[%c0_147, %c3_148, %c0_149, %c0_150], %155 {strides = array<i32>} : memref<2x4x4x128xf32, #tpu.memory_space<vmem>>, vector<1x1x4x128xf32>,
    %cst_151 = arith.constant 0.000000e+00 : f32
    %156 = vector.broadcast %cst_151 : f32 to vector<4x128xf32>
    %c0_152 = arith.constant 0 : index
    %c0_153 = arith.constant 0 : index
    %c0_154 = arith.constant 0 : index
    %c0_155 = arith.constant 0 : index
    %157 = vector.load %arg3[%c0_152, %c0_153, %c0_154, %c0_155] : memref<4x4x4x128xf32, #tpu.memory_space<vmem>>, vector<1x4x4x128xf32>
    %158 = vector.shape_cast %157 : vector<1x4x4x128xf32> to vector<4x4x128xf32>
    %c1_156 = arith.constant 1 : index
    %c0_157 = arith.constant 0 : index
    %c0_158 = arith.constant 0 : index
    %c0_159 = arith.constant 0 : index
    %159 = vector.load %arg2[%c1_156, %c0_157, %c0_158, %c0_159] : memref<2x4x4x128xf32, #tpu.memory_space<vmem>>, vector<1x1x4x128xf32>
    %160 = vector.shape_cast %159 : vector<1x1x4x128xf32> to vector<4x128xf32>
    %161 = vector.shape_cast %160 : vector<4x128xf32> to vector<4x1x128xf32>
    %162 = vector.broadcast %161 : vector<4x1x128xf32> to vector<4x4x128xf32>
    %163 = arith.mulf %158, %162 : vector<4x4x128xf32>
    %c1_160 = arith.constant 1 : index
    %c0_161 = arith.constant 0 : index
    %c0_162 = arith.constant 0 : index
    %c0_163 = arith.constant 0 : index
    %164 = vector.load %arg3[%c1_160, %c0_161, %c0_162, %c0_163] : memref<4x4x4x128xf32, #tpu.memory_space<vmem>>, vector<1x4x4x128xf32>
    %165 = vector.shape_cast %164 : vector<1x4x4x128xf32> to vector<4x4x128xf32>
    %c1_164 = arith.constant 1 : index
    %c1_165 = arith.constant 1 : index
    %c0_166 = arith.constant 0 : index
    %c0_167 = arith.constant 0 : index
    %166 = vector.load %arg2[%c1_164, %c1_165, %c0_166, %c0_167] : memref<2x4x4x128xf32, #tpu.memory_space<vmem>>, vector<1x1x4x128xf32>
    %167 = vector.shape_cast %166 : vector<1x1x4x128xf32> to vector<4x128xf32>
    %168 = vector.shape_cast %167 : vector<4x128xf32> to vector<4x1x128xf32>
    %169 = vector.broadcast %168 : vector<4x1x128xf32> to vector<4x4x128xf32>
    %170 = arith.mulf %165, %169 : vector<4x4x128xf32>
    %171 = arith.addf %163, %170 : vector<4x4x128xf32>
    %c2_168 = arith.constant 2 : index
    %c0_169 = arith.constant 0 : index
    %c0_170 = arith.constant 0 : index
    %c0_171 = arith.constant 0 : index
    %172 = vector.load %arg3[%c2_168, %c0_169, %c0_170, %c0_171] : memref<4x4x4x128xf32, #tpu.memory_space<vmem>>, vector<1x4x4x128xf32>
    %173 = vector.shape_cast %172 : vector<1x4x4x128xf32> to vector<4x4x128xf32>
    %c1_172 = arith.constant 1 : index
    %c2_173 = arith.constant 2 : index
    %c0_174 = arith.constant 0 : index
    %c0_175 = arith.constant 0 : index
    %174 = vector.load %arg2[%c1_172, %c2_173, %c0_174, %c0_175] : memref<2x4x4x128xf32, #tpu.memory_space<vmem>>, vector<1x1x4x128xf32>
    %175 = vector.shape_cast %174 : vector<1x1x4x128xf32> to vector<4x128xf32>
    %176 = vector.shape_cast %175 : vector<4x128xf32> to vector<4x1x128xf32>
    %177 = vector.broadcast %176 : vector<4x1x128xf32> to vector<4x4x128xf32>
    %178 = arith.mulf %173, %177 : vector<4x4x128xf32>
    %179 = arith.addf %171, %178 : vector<4x4x128xf32>
    %c3_176 = arith.constant 3 : index
    %c0_177 = arith.constant 0 : index
    %c0_178 = arith.constant 0 : index
    %c0_179 = arith.constant 0 : index
    %180 = vector.load %arg3[%c3_176, %c0_177, %c0_178, %c0_179] : memref<4x4x4x128xf32, #tpu.memory_space<vmem>>, vector<1x4x4x128xf32>
    %181 = vector.shape_cast %180 : vector<1x4x4x128xf32> to vector<4x4x128xf32>
    %c1_180 = arith.constant 1 : index
    %c3_181 = arith.constant 3 : index
    %c0_182 = arith.constant 0 : index
    %c0_183 = arith.constant 0 : index
    %182 = vector.load %arg2[%c1_180, %c3_181, %c0_182, %c0_183] : memref<2x4x4x128xf32, #tpu.memory_space<vmem>>, vector<1x1x4x128xf32>
    %183 = vector.shape_cast %182 : vector<1x1x4x128xf32> to vector<4x128xf32>
    %184 = vector.shape_cast %183 : vector<4x128xf32> to vector<4x1x128xf32>
    %185 = vector.broadcast %184 : vector<4x1x128xf32> to vector<4x4x128xf32>
    %186 = arith.mulf %181, %185 : vector<4x4x128xf32>
    %cst_184 = arith.constant -1.000000e+00 : f32
    %187 = vector.broadcast %cst_184 : f32 to vector<4x4x128xf32>
    %188 = arith.mulf %187, %186 : vector<4x4x128xf32>
    %189 = arith.addf %179, %188 : vector<4x4x128xf32>
    %cst_185 = arith.constant dense<0.000000e+00> : vector<4x128xf32>
    %190 = vector.multi_reduction <add>, %189, %cst_185 [0] : vector<4x4x128xf32> to vector<4x128xf32>
    %191 = arith.addf %156, %190 : vector<4x128xf32>
    %c1_186 = arith.constant 1 : index
    %c0_187 = arith.constant 0 : index
    %c0_188 = arith.constant 0 : index
    %c0_189 = arith.constant 0 : index
    %192 = vector.load %arg4[%c1_186, %c0_187, %c0_188, %c0_189] : memref<2x4x4x128xf32, #tpu.memory_space<vmem>>, vector<1x1x4x128xf32>
    %193 = vector.shape_cast %192 : vector<1x1x4x128xf32> to vector<4x128xf32>
    %194 = vector.shape_cast %191 : vector<4x128xf32> to vector<1x1x4x128xf32>
    tpu.vector_store %arg4[%c1_186, %c0_187, %c0_188, %c0_189], %194 {strides = array<i32>} : memref<2x4x4x128xf32, #tpu.memory_space<vmem>>, vector<1x1x4x128xf32>,
    %cst_190 = arith.constant 0.000000e+00 : f32
    %195 = vector.broadcast %cst_190 : f32 to vector<4x128xf32>
    %c1_191 = arith.constant 1 : index
    %c0_192 = arith.constant 0 : index
    %c0_193 = arith.constant 0 : index
    %c0_194 = arith.constant 0 : index
    %196 = vector.load %arg3[%c1_191, %c0_192, %c0_193, %c0_194] : memref<4x4x4x128xf32, #tpu.memory_space<vmem>>, vector<1x4x4x128xf32>
    %197 = vector.shape_cast %196 : vector<1x4x4x128xf32> to vector<4x4x128xf32>
    %c1_195 = arith.constant 1 : index
    %c0_196 = arith.constant 0 : index
    %c0_197 = arith.constant 0 : index
    %c0_198 = arith.constant 0 : index
    %198 = vector.load %arg2[%c1_195, %c0_196, %c0_197, %c0_198] : memref<2x4x4x128xf32, #tpu.memory_space<vmem>>, vector<1x1x4x128xf32>
    %199 = vector.shape_cast %198 : vector<1x1x4x128xf32> to vector<4x128xf32>
    %200 = vector.shape_cast %199 : vector<4x128xf32> to vector<4x1x128xf32>
    %201 = vector.broadcast %200 : vector<4x1x128xf32> to vector<4x4x128xf32>
    %202 = arith.mulf %197, %201 : vector<4x4x128xf32>
    %c0_199 = arith.constant 0 : index
    %c0_200 = arith.constant 0 : index
    %c0_201 = arith.constant 0 : index
    %c0_202 = arith.constant 0 : index
    %203 = vector.load %arg3[%c0_199, %c0_200, %c0_201, %c0_202] : memref<4x4x4x128xf32, #tpu.memory_space<vmem>>, vector<1x4x4x128xf32>
    %204 = vector.shape_cast %203 : vector<1x4x4x128xf32> to vector<4x4x128xf32>
    %c1_203 = arith.constant 1 : index
    %c1_204 = arith.constant 1 : index
    %c0_205 = arith.constant 0 : index
    %c0_206 = arith.constant 0 : index
    %205 = vector.load %arg2[%c1_203, %c1_204, %c0_205, %c0_206] : memref<2x4x4x128xf32, #tpu.memory_space<vmem>>, vector<1x1x4x128xf32>
    %206 = vector.shape_cast %205 : vector<1x1x4x128xf32> to vector<4x128xf32>
    %207 = vector.shape_cast %206 : vector<4x128xf32> to vector<4x1x128xf32>
    %208 = vector.broadcast %207 : vector<4x1x128xf32> to vector<4x4x128xf32>
    %209 = arith.mulf %204, %208 : vector<4x4x128xf32>
    %210 = arith.addf %202, %209 : vector<4x4x128xf32>
    %c3_207 = arith.constant 3 : index
    %c0_208 = arith.constant 0 : index
    %c0_209 = arith.constant 0 : index
    %c0_210 = arith.constant 0 : index
    %211 = vector.load %arg3[%c3_207, %c0_208, %c0_209, %c0_210] : memref<4x4x4x128xf32, #tpu.memory_space<vmem>>, vector<1x4x4x128xf32>
    %212 = vector.shape_cast %211 : vector<1x4x4x128xf32> to vector<4x4x128xf32>
    %c1_211 = arith.constant 1 : index
    %c2_212 = arith.constant 2 : index
    %c0_213 = arith.constant 0 : index
    %c0_214 = arith.constant 0 : index
    %213 = vector.load %arg2[%c1_211, %c2_212, %c0_213, %c0_214] : memref<2x4x4x128xf32, #tpu.memory_space<vmem>>, vector<1x1x4x128xf32>
    %214 = vector.shape_cast %213 : vector<1x1x4x128xf32> to vector<4x128xf32>
    %215 = vector.shape_cast %214 : vector<4x128xf32> to vector<4x1x128xf32>
    %216 = vector.broadcast %215 : vector<4x1x128xf32> to vector<4x4x128xf32>
    %217 = arith.mulf %212, %216 : vector<4x4x128xf32>
    %cst_215 = arith.constant -1.000000e+00 : f32
    %218 = vector.broadcast %cst_215 : f32 to vector<4x4x128xf32>
    %219 = arith.mulf %218, %217 : vector<4x4x128xf32>
    %220 = arith.addf %210, %219 : vector<4x4x128xf32>
    %c2_216 = arith.constant 2 : index
    %c0_217 = arith.constant 0 : index
    %c0_218 = arith.constant 0 : index
    %c0_219 = arith.constant 0 : index
    %221 = vector.load %arg3[%c2_216, %c0_217, %c0_218, %c0_219] : memref<4x4x4x128xf32, #tpu.memory_space<vmem>>, vector<1x4x4x128xf32>
    %222 = vector.shape_cast %221 : vector<1x4x4x128xf32> to vector<4x4x128xf32>
    %c1_220 = arith.constant 1 : index
    %c3_221 = arith.constant 3 : index
    %c0_222 = arith.constant 0 : index
    %c0_223 = arith.constant 0 : index
    %223 = vector.load %arg2[%c1_220, %c3_221, %c0_222, %c0_223] : memref<2x4x4x128xf32, #tpu.memory_space<vmem>>, vector<1x1x4x128xf32>
    %224 = vector.shape_cast %223 : vector<1x1x4x128xf32> to vector<4x128xf32>
    %225 = vector.shape_cast %224 : vector<4x128xf32> to vector<4x1x128xf32>
    %226 = vector.broadcast %225 : vector<4x1x128xf32> to vector<4x4x128xf32>
    %227 = arith.mulf %222, %226 : vector<4x4x128xf32>
    %228 = arith.addf %220, %227 : vector<4x4x128xf32>
    %cst_224 = arith.constant dense<0.000000e+00> : vector<4x128xf32>
    %229 = vector.multi_reduction <add>, %228, %cst_224 [0] : vector<4x4x128xf32> to vector<4x128xf32>
    %230 = arith.addf %195, %229 : vector<4x128xf32>
    %c1_225 = arith.constant 1 : index
    %c1_226 = arith.constant 1 : index
    %c0_227 = arith.constant 0 : index
    %c0_228 = arith.constant 0 : index
    %231 = vector.load %arg4[%c1_225, %c1_226, %c0_227, %c0_228] : memref<2x4x4x128xf32, #tpu.memory_space<vmem>>, vector<1x1x4x128xf32>
    %232 = vector.shape_cast %231 : vector<1x1x4x128xf32> to vector<4x128xf32>
    %233 = vector.shape_cast %230 : vector<4x128xf32> to vector<1x1x4x128xf32>
    tpu.vector_store %arg4[%c1_225, %c1_226, %c0_227, %c0_228], %233 {strides = array<i32>} : memref<2x4x4x128xf32, #tpu.memory_space<vmem>>, vector<1x1x4x128xf32>,
    %cst_229 = arith.constant 0.000000e+00 : f32
    %234 = vector.broadcast %cst_229 : f32 to vector<4x128xf32>
    %c2_230 = arith.constant 2 : index
    %c0_231 = arith.constant 0 : index
    %c0_232 = arith.constant 0 : index
    %c0_233 = arith.constant 0 : index
    %235 = vector.load %arg3[%c2_230, %c0_231, %c0_232, %c0_233] : memref<4x4x4x128xf32, #tpu.memory_space<vmem>>, vector<1x4x4x128xf32>
    %236 = vector.shape_cast %235 : vector<1x4x4x128xf32> to vector<4x4x128xf32>
    %c1_234 = arith.constant 1 : index
    %c0_235 = arith.constant 0 : index
    %c0_236 = arith.constant 0 : index
    %c0_237 = arith.constant 0 : index
    %237 = vector.load %arg2[%c1_234, %c0_235, %c0_236, %c0_237] : memref<2x4x4x128xf32, #tpu.memory_space<vmem>>, vector<1x1x4x128xf32>
    %238 = vector.shape_cast %237 : vector<1x1x4x128xf32> to vector<4x128xf32>
    %239 = vector.shape_cast %238 : vector<4x128xf32> to vector<4x1x128xf32>
    %240 = vector.broadcast %239 : vector<4x1x128xf32> to vector<4x4x128xf32>
    %241 = arith.mulf %236, %240 : vector<4x4x128xf32>
    %c3_238 = arith.constant 3 : index
    %c0_239 = arith.constant 0 : index
    %c0_240 = arith.constant 0 : index
    %c0_241 = arith.constant 0 : index
    %242 = vector.load %arg3[%c3_238, %c0_239, %c0_240, %c0_241] : memref<4x4x4x128xf32, #tpu.memory_space<vmem>>, vector<1x4x4x128xf32>
    %243 = vector.shape_cast %242 : vector<1x4x4x128xf32> to vector<4x4x128xf32>
    %c1_242 = arith.constant 1 : index
    %c1_243 = arith.constant 1 : index
    %c0_244 = arith.constant 0 : index
    %c0_245 = arith.constant 0 : index
    %244 = vector.load %arg2[%c1_242, %c1_243, %c0_244, %c0_245] : memref<2x4x4x128xf32, #tpu.memory_space<vmem>>, vector<1x1x4x128xf32>
    %245 = vector.shape_cast %244 : vector<1x1x4x128xf32> to vector<4x128xf32>
    %246 = vector.shape_cast %245 : vector<4x128xf32> to vector<4x1x128xf32>
    %247 = vector.broadcast %246 : vector<4x1x128xf32> to vector<4x4x128xf32>
    %248 = arith.mulf %243, %247 : vector<4x4x128xf32>
    %249 = arith.addf %241, %248 : vector<4x4x128xf32>
    %c0_246 = arith.constant 0 : index
    %c0_247 = arith.constant 0 : index
    %c0_248 = arith.constant 0 : index
    %c0_249 = arith.constant 0 : index
    %250 = vector.load %arg3[%c0_246, %c0_247, %c0_248, %c0_249] : memref<4x4x4x128xf32, #tpu.memory_space<vmem>>, vector<1x4x4x128xf32>
    %251 = vector.shape_cast %250 : vector<1x4x4x128xf32> to vector<4x4x128xf32>
    %c1_250 = arith.constant 1 : index
    %c2_251 = arith.constant 2 : index
    %c0_252 = arith.constant 0 : index
    %c0_253 = arith.constant 0 : index
    %252 = vector.load %arg2[%c1_250, %c2_251, %c0_252, %c0_253] : memref<2x4x4x128xf32, #tpu.memory_space<vmem>>, vector<1x1x4x128xf32>
    %253 = vector.shape_cast %252 : vector<1x1x4x128xf32> to vector<4x128xf32>
    %254 = vector.shape_cast %253 : vector<4x128xf32> to vector<4x1x128xf32>
    %255 = vector.broadcast %254 : vector<4x1x128xf32> to vector<4x4x128xf32>
    %256 = arith.mulf %251, %255 : vector<4x4x128xf32>
    %257 = arith.addf %249, %256 : vector<4x4x128xf32>
    %c1_254 = arith.constant 1 : index
    %c0_255 = arith.constant 0 : index
    %c0_256 = arith.constant 0 : index
    %c0_257 = arith.constant 0 : index
    %258 = vector.load %arg3[%c1_254, %c0_255, %c0_256, %c0_257] : memref<4x4x4x128xf32, #tpu.memory_space<vmem>>, vector<1x4x4x128xf32>
    %259 = vector.shape_cast %258 : vector<1x4x4x128xf32> to vector<4x4x128xf32>
    %c1_258 = arith.constant 1 : index
    %c3_259 = arith.constant 3 : index
    %c0_260 = arith.constant 0 : index
    %c0_261 = arith.constant 0 : index
    %260 = vector.load %arg2[%c1_258, %c3_259, %c0_260, %c0_261] : memref<2x4x4x128xf32, #tpu.memory_space<vmem>>, vector<1x1x4x128xf32>
    %261 = vector.shape_cast %260 : vector<1x1x4x128xf32> to vector<4x128xf32>
    %262 = vector.shape_cast %261 : vector<4x128xf32> to vector<4x1x128xf32>
    %263 = vector.broadcast %262 : vector<4x1x128xf32> to vector<4x4x128xf32>
    %264 = arith.mulf %259, %263 : vector<4x4x128xf32>
    %cst_262 = arith.constant -1.000000e+00 : f32
    %265 = vector.broadcast %cst_262 : f32 to vector<4x4x128xf32>
    %266 = arith.mulf %265, %264 : vector<4x4x128xf32>
    %267 = arith.addf %257, %266 : vector<4x4x128xf32>
    %cst_263 = arith.constant dense<0.000000e+00> : vector<4x128xf32>
    %268 = vector.multi_reduction <add>, %267, %cst_263 [0] : vector<4x4x128xf32> to vector<4x128xf32>
    %269 = arith.addf %234, %268 : vector<4x128xf32>
    %c1_264 = arith.constant 1 : index
    %c2_265 = arith.constant 2 : index
    %c0_266 = arith.constant 0 : index
    %c0_267 = arith.constant 0 : index
    %270 = vector.load %arg4[%c1_264, %c2_265, %c0_266, %c0_267] : memref<2x4x4x128xf32, #tpu.memory_space<vmem>>, vector<1x1x4x128xf32>
    %271 = vector.shape_cast %270 : vector<1x1x4x128xf32> to vector<4x128xf32>
    %272 = vector.shape_cast %269 : vector<4x128xf32> to vector<1x1x4x128xf32>
    tpu.vector_store %arg4[%c1_264, %c2_265, %c0_266, %c0_267], %272 {strides = array<i32>} : memref<2x4x4x128xf32, #tpu.memory_space<vmem>>, vector<1x1x4x128xf32>,
    %cst_268 = arith.constant 0.000000e+00 : f32
    %273 = vector.broadcast %cst_268 : f32 to vector<4x128xf32>
    %c3_269 = arith.constant 3 : index
    %c0_270 = arith.constant 0 : index
    %c0_271 = arith.constant 0 : index
    %c0_272 = arith.constant 0 : index
    %274 = vector.load %arg3[%c3_269, %c0_270, %c0_271, %c0_272] : memref<4x4x4x128xf32, #tpu.memory_space<vmem>>, vector<1x4x4x128xf32>
    %275 = vector.shape_cast %274 : vector<1x4x4x128xf32> to vector<4x4x128xf32>
    %c1_273 = arith.constant 1 : index
    %c0_274 = arith.constant 0 : index
    %c0_275 = arith.constant 0 : index
    %c0_276 = arith.constant 0 : index
    %276 = vector.load %arg2[%c1_273, %c0_274, %c0_275, %c0_276] : memref<2x4x4x128xf32, #tpu.memory_space<vmem>>, vector<1x1x4x128xf32>
    %277 = vector.shape_cast %276 : vector<1x1x4x128xf32> to vector<4x128xf32>
    %278 = vector.shape_cast %277 : vector<4x128xf32> to vector<4x1x128xf32>
    %279 = vector.broadcast %278 : vector<4x1x128xf32> to vector<4x4x128xf32>
    %280 = arith.mulf %275, %279 : vector<4x4x128xf32>
    %c2_277 = arith.constant 2 : index
    %c0_278 = arith.constant 0 : index
    %c0_279 = arith.constant 0 : index
    %c0_280 = arith.constant 0 : index
    %281 = vector.load %arg3[%c2_277, %c0_278, %c0_279, %c0_280] : memref<4x4x4x128xf32, #tpu.memory_space<vmem>>, vector<1x4x4x128xf32>
    %282 = vector.shape_cast %281 : vector<1x4x4x128xf32> to vector<4x4x128xf32>
    %c1_281 = arith.constant 1 : index
    %c1_282 = arith.constant 1 : index
    %c0_283 = arith.constant 0 : index
    %c0_284 = arith.constant 0 : index
    %283 = vector.load %arg2[%c1_281, %c1_282, %c0_283, %c0_284] : memref<2x4x4x128xf32, #tpu.memory_space<vmem>>, vector<1x1x4x128xf32>
    %284 = vector.shape_cast %283 : vector<1x1x4x128xf32> to vector<4x128xf32>
    %285 = vector.shape_cast %284 : vector<4x128xf32> to vector<4x1x128xf32>
    %286 = vector.broadcast %285 : vector<4x1x128xf32> to vector<4x4x128xf32>
    %287 = arith.mulf %282, %286 : vector<4x4x128xf32>
    %288 = arith.addf %280, %287 : vector<4x4x128xf32>
    %c1_285 = arith.constant 1 : index
    %c0_286 = arith.constant 0 : index
    %c0_287 = arith.constant 0 : index
    %c0_288 = arith.constant 0 : index
    %289 = vector.load %arg3[%c1_285, %c0_286, %c0_287, %c0_288] : memref<4x4x4x128xf32, #tpu.memory_space<vmem>>, vector<1x4x4x128xf32>
    %290 = vector.shape_cast %289 : vector<1x4x4x128xf32> to vector<4x4x128xf32>
    %c1_289 = arith.constant 1 : index
    %c2_290 = arith.constant 2 : index
    %c0_291 = arith.constant 0 : index
    %c0_292 = arith.constant 0 : index
    %291 = vector.load %arg2[%c1_289, %c2_290, %c0_291, %c0_292] : memref<2x4x4x128xf32, #tpu.memory_space<vmem>>, vector<1x1x4x128xf32>
    %292 = vector.shape_cast %291 : vector<1x1x4x128xf32> to vector<4x128xf32>
    %293 = vector.shape_cast %292 : vector<4x128xf32> to vector<4x1x128xf32>
    %294 = vector.broadcast %293 : vector<4x1x128xf32> to vector<4x4x128xf32>
    %295 = arith.mulf %290, %294 : vector<4x4x128xf32>
    %cst_293 = arith.constant -1.000000e+00 : f32
    %296 = vector.broadcast %cst_293 : f32 to vector<4x4x128xf32>
    %297 = arith.mulf %296, %295 : vector<4x4x128xf32>
    %298 = arith.addf %288, %297 : vector<4x4x128xf32>
    %c0_294 = arith.constant 0 : index
    %c0_295 = arith.constant 0 : index
    %c0_296 = arith.constant 0 : index
    %c0_297 = arith.constant 0 : index
    %299 = vector.load %arg3[%c0_294, %c0_295, %c0_296, %c0_297] : memref<4x4x4x128xf32, #tpu.memory_space<vmem>>, vector<1x4x4x128xf32>
    %300 = vector.shape_cast %299 : vector<1x4x4x128xf32> to vector<4x4x128xf32>
    %c1_298 = arith.constant 1 : index
    %c3_299 = arith.constant 3 : index
    %c0_300 = arith.constant 0 : index
    %c0_301 = arith.constant 0 : index
    %301 = vector.load %arg2[%c1_298, %c3_299, %c0_300, %c0_301] : memref<2x4x4x128xf32, #tpu.memory_space<vmem>>, vector<1x1x4x128xf32>
    %302 = vector.shape_cast %301 : vector<1x1x4x128xf32> to vector<4x128xf32>
    %303 = vector.shape_cast %302 : vector<4x128xf32> to vector<4x1x128xf32>
    %304 = vector.broadcast %303 : vector<4x1x128xf32> to vector<4x4x128xf32>
    %305 = arith.mulf %300, %304 : vector<4x4x128xf32>
    %306 = arith.addf %298, %305 : vector<4x4x128xf32>
    %cst_302 = arith.constant dense<0.000000e+00> : vector<4x128xf32>
    %307 = vector.multi_reduction <add>, %306, %cst_302 [0] : vector<4x4x128xf32> to vector<4x128xf32>
    %308 = arith.addf %273, %307 : vector<4x128xf32>
    %c1_303 = arith.constant 1 : index
    %c3_304 = arith.constant 3 : index
    %c0_305 = arith.constant 0 : index
    %c0_306 = arith.constant 0 : index
    %309 = vector.load %arg4[%c1_303, %c3_304, %c0_305, %c0_306] : memref<2x4x4x128xf32, #tpu.memory_space<vmem>>, vector<1x1x4x128xf32>
    %310 = vector.shape_cast %309 : vector<1x1x4x128xf32> to vector<4x128xf32>
    %311 = vector.shape_cast %308 : vector<4x128xf32> to vector<1x1x4x128xf32>
    tpu.vector_store %arg4[%c1_303, %c3_304, %c0_305, %c0_306], %311 {strides = array<i32>} : memref<2x4x4x128xf32, #tpu.memory_space<vmem>>, vector<1x1x4x128xf32>,
    return
  }
  func.func @transform_0(%arg0: i32, %arg1: i32) -> (i32, i32, i32, i32) {
    %c0_i32 = arith.constant 0 : i32
    %c0_i32_0 = arith.constant 0 : i32
    %c0_i32_1 = arith.constant 0 : i32
    %c0_i32_2 = arith.constant 0 : i32
    return %c0_i32, %c0_i32_0, %c0_i32_1, %arg1 : i32, i32, i32, i32
  }
  func.func @transform_1(%arg0: i32, %arg1: i32) -> (i32, i32, i32, i32) {
    %c0_i32 = arith.constant 0 : i32
    %c0_i32_0 = arith.constant 0 : i32
    %c0_i32_1 = arith.constant 0 : i32
    return %c0_i32, %c0_i32_0, %arg0, %arg1 : i32, i32, i32, i32
  }
  func.func @transform_2(%arg0: i32, %arg1: i32) -> (i32, i32, i32, i32) {
    %c0_i32 = arith.constant 0 : i32
    %c0_i32_0 = arith.constant 0 : i32
    %c0_i32_1 = arith.constant 0 : i32
    return %c0_i32, %c0_i32_0, %arg0, %arg1 : i32, i32, i32, i32
  }
}

</mosaic_0001>

<bundles_post_ra>
// kernel: tpu_custom_call.1
= control target key start
LH: loop header
LB: loop body
LE: loop exit
PB: predicated region body
PF: predicated region fallthrough
CT: control target
= control target key end

     0   :  { %7 = vsyncpa [#allocation3], 0  ;;  %s2456_s0 = inlined_call_operand.hbm [shape: f32[2,4,4,128], index: 0, kind: input, shape index: {}]   ;;  %s2457_s1 = inlined_call_operand.hbm [shape: f32[4,4,4,128], index: 1, kind: input, shape index: {}]   ;;  %s2458_s2 = inlined_call_operand.hbm [shape: f32[2,4,4,128], index: 2, kind: output, shape index: {}]  }
   0x1   :  { %8 = vsyncpa [#allocation6], 0 }
   0x2   :  { %9 = vsyncpa [#allocation4], 0  ;;  %s2114_s9 = smov [#allocation2]   ;;  %s2042_s13 = scalar_lea.hbm %s2456_s0, 512 }
   0x3   :  { %s15_s10 = sshll.u32 %s2114_s9, 4  ;;  %p2043_p0 = scmp.ne.s32.totalorder %s2456_s0, %s2042_s13  ;;  %s16_s10 = int_to_ptr.vmem [resolvable:$true] %s15_s10 }
   0x4   :  { %p2046_p1 = scmp.lt.u32.totalorder %s2042_s13, %s2456_s0 }
   0x6   :  { %p2048_p2 = pnand %p2046_p1, %p2043_p0 }
   0x8   :  { %2051 = shalt.err (!%p2048_p2)
}
   0x9   :  { %s2052_s18 = scalar_lea.vmem %s16_s10, 512  ;;  %p2057_p4 = scmp.lt.s32.totalorder %s16_s10, %s16_s10 }
   0xa   :  { %p2053_p3 = scmp.ne.s32.totalorder %s16_s10, %s2052_s18  ;;  %p2058_p5 = scmp.lt.s32.totalorder %s2052_s18, %s2052_s18 }
   0xc   :  { %p2059_p6 = por %p2058_p5, %p2057_p4 }
   0xe   :  { %p2060_p7 = pnand %p2059_p6, %p2053_p3 }
  0x10   :  { %2063 = shalt.err (!%p2060_p7)
}
  0x11   :  { %s2115_s19 = smov 64   ;;  %s2116_s20 = smov 4  }
  0x12   :  { %21 = dma.hbm_to_vmem [thread:$0]  %s2456_s0, 512, %s16_s10, [#allocation3], %s2115_s19, %s2115_s19, %s2116_s20  }
  0x13   :  { %s2117_s23 = smov [#allocation5]   ;;  %s2064_s27 = scalar_lea.hbm %s2457_s1, 1024 }
  0x14   :  { %s27_s24 = sshll.u32 %s2117_s23, 4  ;;  %p2065_p8 = scmp.ne.s32.totalorder %s2457_s1, %s2064_s27  ;;  %s28_s24 = int_to_ptr.vmem [resolvable:$true] %s27_s24 }
  0x15   :  { %p2068_p9 = scmp.lt.u32.totalorder %s2064_s27, %s2457_s1 }
  0x17   :  { %p2070_p10 = pnand %p2068_p9, %p2065_p8 }
  0x19   :  { %2073 = shalt.err (!%p2070_p10)
}
  0x1a   :  { %s2074_s4 = scalar_lea.vmem %s28_s24, 1024  ;;  %p2079_p12 = scmp.lt.s32.totalorder %s28_s24, %s28_s24 }
  0x1b   :  { %p2075_p11 = scmp.ne.s32.totalorder %s28_s24, %s2074_s4  ;;  %p2080_p13 = scmp.lt.s32.totalorder %s2074_s4, %s2074_s4 }
  0x1d   :  { %p2081_p0 = por %p2080_p13, %p2079_p12 }
  0x1f   :  { %p2082_p1 = pnand %p2081_p0, %p2075_p11 }
  0x21   :  { %2085 = shalt.err (!%p2082_p1)
}
  0x22   :  { %33 = dma.hbm_to_vmem [thread:$0]  %s2457_s1, 1024, %s28_s24, [#allocation6], %s2115_s19, %s2115_s19, %s2116_s20  }
  0x23   :  { %2108 = dma.done.wait [#allocation3], 512  }
  0x24   :  { %2109 = vsyncadd [#allocation3], 4294966784 }
  0x25   :  { %2110 = dma.done.wait [#allocation6], 1024  }
  0x26   :  { %2111 = vsyncadd [#allocation6], 4294966272  ;;  %v57_v0 = vlaneseq  ;;  %v2118_v1 = vmov 1966171168   ;;  %v40_v10 = vld [vmem:[#allocation5] sm:$0xf] }
  0x27   :  { %v55_v2 = vunpack.c.l.s4 %v2118_v1  ;;  %v2004_v7 = vld.sshfl [vmem:[#allocation2] sm:$0x33 pattern:$0x75316420]  ;;  %v41_v12 = vld [vmem:[#allocation5 + $0x4] sm:$0xf] }
  0x28   :  { %v58_v3 = vshrl.u32 %v57_v0, 7  ;;  %v53_v8 = vcombine.high %v2004_v7, %v2004_v7  ;;  %v2005_v11 = vld.sshfl [vmem:[#allocation2 + $0x4] sm:$0x33 pattern:$0x75316420]  ;;  %vm278_vm0 = vcmask 1043456  }
  0x29   :  { %v56_v4 = vunpack.c.0.s8 %v55_v2  ;;  %v109_v16 = vcombine.high %v2005_v11, %v2005_v11  ;;  %v42_v17 = vld [vmem:[#allocation5 + $0x8] sm:$0xf]  ;;  %v95_v24 = vld [vmem:[#allocation5 + $0x10] sm:$0xf]  ;;  %v43_v25 = vld [vmem:[#allocation5 + $0xc] sm:$0xf] }
  0x2a   :  { %v2167_v6 = vsub.s32 0, %v58_v3  ;;  %v2006_v19 = vld.sshfl [vmem:[#allocation2 + $0x8] sm:$0x33 pattern:$0x75316420]  ;;  %s2119_s1 = smov [#allocation7]  }
  0x2b   :  { %v2165_v5 = vsub.s32 %v56_v4, %v58_v3  ;;  %v169_v29 = vcombine.high %v2006_v19, %v2006_v19  ;;  %v96_v33 = vld [vmem:[#allocation5 + $0x14] sm:$0xf]  ;;  %v97_v34 = vld [vmem:[#allocation5 + $0x18] sm:$0xf]  ;;  %v155_v40 = vld [vmem:[#allocation5 + $0x20] sm:$0xf] }
  0x2c   :  { %v98_v42 = vld [vmem:[#allocation5 + $0x1c] sm:$0xf]  ;;  %v2007_v46 = vld.sshfl [vmem:[#allocation2 + $0xc] sm:$0x33 pattern:$0x75316420] }
  0x2d   :  { %v60_v9 = vrot.slane %v2004_v7, %v2165_v5  ;;  %v67_v13 = vrot.slane %v53_v8, %v2165_v5  ;;  %v116_v18 = vrot.slane %v2005_v11, %v2165_v5  ;;  %v123_v26 = vrot.slane %v109_v16, %v2165_v5  ;;  %v156_v51 = vld [vmem:[#allocation5 + $0x24] sm:$0xf]  ;;  %v157_v52 = vld [vmem:[#allocation5 + $0x28] sm:$0xf]  ;;  %v288_v57 = vld [vmem:[#allocation5 + $0x10] sm:$0xf] }
  0x2e   :  { %v176_v35 = vrot.slane %v2006_v19, %v2165_v5  ;;  %v183_v43 = vrot.slane %v169_v29, %v2165_v5  ;;  %v158_v61 = vld [vmem:[#allocation5 + $0x2c] sm:$0xf]  ;;  %v229_v62 = vcombine.high %v2007_v46, %v2007_v46  ;;  %v289_v63 = vld [vmem:[#allocation5 + $0x14] sm:$0xf]  ;;  %v236_v7 = vrot.slane %v2007_v46, %v2165_v5  ;;  %s1991_s6 = sshll.u32 %s2119_s1, 4  ;;  %s1992_s6 = int_to_ptr.vmem [resolvable:$true] %s1991_s6 }
  0x2f   :  { %v68_v14 = vcombine.high %v60_v9, %v60_v9  ;;  %v2172_v15 = vrot.slane %v60_v9, %v2167_v6  ;;  %v69_v20 = vcombine.high %v67_v13, %v67_v13  ;;  %v2176_v21 = vrot.slane %v67_v13, %v2167_v6  ;;  %v290_v9 = vld [vmem:[#allocation5 + $0x18] sm:$0xf]  ;;  %v345_v29 = vld [vmem:[#allocation5 + $0xc] sm:$0xf]  ;;  %s2086_s7 = scalar_lea.vmem %s1992_s6, 512  ;;  %p2091_p3 = scmp.lt.s32.totalorder %s1992_s6, %s1992_s6 }
  0x30   :  { %v124_v27 = vcombine.high %v116_v18, %v116_v18  ;;  %v2184_v28 = vrot.slane %v116_v18, %v2167_v6  ;;  %v125_v36 = vcombine.high %v123_v26, %v123_v26  ;;  %v2193_v37 = vrot.slane %v123_v26, %v2167_v6  ;;  %v216_v18 = vld [vmem:[#allocation5 + $0x34] sm:$0xf]  ;;  %v343_v26 = vld [vmem:[#allocation5 + $0x4] sm:$0xf]  ;;  %p2087_p2 = scmp.ne.s32.totalorder %s1992_s6, %s2086_s7  ;;  %p2092_p4 = scmp.lt.s32.totalorder %s2086_s7, %s2086_s7 }
  0x31   :  { %v2179_v22 = vrot.slane %v68_v14, %v2167_v6  ;;  %v90_v23 = vmul.f32 %v2172_v15, %v40_v10  ;;  %v2187_v30 = vrot.slane %v69_v20, %v2167_v6  ;;  %v91_v31 = vmul.f32 %v2176_v21, %v41_v12  ;;  %v291_v10 = vld [vmem:[#allocation5 + $0x1c] sm:$0xf]  ;;  %v342_v12 = vld [vmem:[#allocation5] sm:$0xf] }
  0x32   :  { %v2196_v38 = vrot.slane %v124_v27, %v2167_v6  ;;  %v146_v39 = vmul.f32 %v2184_v28, %v95_v24  ;;  %v184_v44 = vcombine.high %v176_v35, %v176_v35  ;;  %v2202_v45 = vrot.slane %v176_v35, %v2167_v6  ;;  %v344_v27 = vld [vmem:[#allocation5 + $0x8] sm:$0xf]  ;;  %p2093_p5 = por %p2092_p4, %p2091_p3 }
  0x33   :  { %v92_v32 = vmul.f32 %v2179_v22, %v42_v17  ;;  %v93_v41 = vmul.f32 %v2187_v30, %v43_v25  ;;  %v2205_v47 = vrot.slane %v125_v36, %v2167_v6  ;;  %v147_v48 = vmul.f32 %v2193_v37, %v96_v33  ;;  %v215_v17 = vld [vmem:[#allocation5 + $0x30] sm:$0xf]  ;;  %v218_v33 = vld [vmem:[#allocation5 + $0x3c] sm:$0xf] }
  0x34   :  { %v148_v49 = vmul.f32 %v2196_v38, %v97_v34  ;;  %v150_v50 = vadd.f32 %v146_v39, %v90_v23  ;;  %v185_v53 = vcombine.high %v183_v43, %v183_v43  ;;  %v2210_v54 = vrot.slane %v183_v43, %v2167_v6  ;;  %v400_v43 = vld [vmem:[#allocation5 + $0x30] sm:$0xf]  ;;  %p2094_p6 = pnand %p2093_p5, %p2087_p2 }
  0x35   :  { %v2213_v55 = vrot.slane %v184_v44, %v2167_v6  ;;  %v206_v56 = vmul.f32 %v2202_v45, %v155_v40  ;;  %v149_v58 = vmul.f32 %v2205_v47, %v98_v42  ;;  %v151_v59 = vadd.f32 %v147_v48, %v91_v31 }
  0x36   :  { %v152_v60 = vadd.f32 %v148_v49, %v92_v32  ;;  %v2218_v0 = vrot.slane %v185_v53, %v2167_v6  ;;  %v207_v1 = vmul.f32 %v2210_v54, %v156_v51  ;;  %v243_v8 = vrot.slane %v229_v62, %v2165_v5  ;;  %v217_v32 = vld [vmem:[#allocation5 + $0x38] sm:$0xf] }
  0x37   :  { %v208_v2 = vmul.f32 %v2213_v55, %v157_v52  ;;  %v210_v3 = vadd.f32 %v206_v56, %v150_v50  ;;  %v153_v4 = vadd.f32 %v149_v58, %v93_v41  ;;  %v338_v11 = vmul.f32 %v288_v57, %v2172_v15  ;;  %v401_v50 = vld [vmem:[#allocation5 + $0x34] sm:$0xf]  ;;  %v402_v57 = vld [vmem:[#allocation5 + $0x38] sm:$0xf]  ;;  %v403_v58 = vld [vmem:[#allocation5 + $0x3c] sm:$0xf] }
  0x38   :  { %v209_v13 = vmul.f32 %v2218_v0, %v158_v61  ;;  %v211_v14 = vadd.f32 %v207_v1, %v151_v59  ;;  %v339_v19 = vmul.f32 %v289_v63, %v2176_v21  ;;  %v244_v20 = vcombine.high %v236_v7, %v236_v7 }
  0x39   :  { %v212_v16 = vadd.f32 %v208_v2, %v152_v60  ;;  %v245_v23 = vcombine.high %v243_v8, %v243_v8  ;;  %v2228_v24 = vrot.slane %v236_v7, %v2167_v6  ;;  %v2231_v25 = vrot.slane %v243_v8, %v2167_v6 }
  0x3a   :  { %v213_v31 = vadd.f32 %v209_v13, %v153_v4  ;;  %v340_v34 = vmul.f32 %v290_v9, %v2179_v22  ;;  %v341_v35 = vmul.f32 %v291_v10, %v2187_v30  ;;  %v392_v36 = vmul.f32 %v342_v12, %v2184_v28  ;;  %v463_v12 = vld [vmem:[#allocation5 + $0x24] sm:$0xf] }
  0x3b   :  { %v2237_v39 = vrot.slane %v244_v20, %v2167_v6  ;;  %v2240_v40 = vrot.slane %v245_v23, %v2167_v6  ;;  %v266_v41 = vmul.f32 %v2228_v24, %v215_v17  ;;  %v267_v42 = vmul.f32 %v2231_v25, %v216_v18  ;;  %v464_v20 = vld [vmem:[#allocation5 + $0x28] sm:$0xf]  ;;  %v465_v23 = vld [vmem:[#allocation5 + $0x2c] sm:$0xf] }
  0x3c   :  { %v393_v44 = vmul.f32 %v343_v26, %v2193_v37  ;;  %v394_v46 = vmul.f32 %v344_v27, %v2196_v38  ;;  %v395_v48 = vmul.f32 %v345_v29, %v2205_v47  ;;  %v396_v49 = vadd.f32 %v392_v36, %v338_v11  ;;  %v462_v11 = vld [vmem:[#allocation5 + $0x20] sm:$0xf] }
  0x3d   :  { %v268_v51 = vmul.f32 %v2237_v39, %v217_v32  ;;  %v269_v52 = vmul.f32 %v2240_v40, %v218_v33  ;;  %v270_v53 = vmul.f32 -1.0, %v266_v41  ;;  %v271_v56 = vmul.f32 -1.0, %v267_v42  ;;  %v530_v29 = vld [vmem:[#allocation5 + $0x20] sm:$0xf] }
  0x3e   :  { %v397_v59 = vadd.f32 %v393_v44, %v339_v19  ;;  %v398_v60 = vadd.f32 %v394_v46, %v340_v34  ;;  %v399_v61 = vadd.f32 %v395_v48, %v341_v35  ;;  %v450_v62 = vmul.f32 %v400_v43, %v2202_v45  ;;  %v533_v44 = vld [vmem:[#allocation5 + $0x2c] sm:$0xf] }
  0x3f   :  { %v272_v63 = vmul.f32 -1.0, %v268_v51  ;;  %v273_v1 = vmul.f32 -1.0, %v269_v52  ;;  %v274_v2 = vadd.f32 %v270_v53, %v210_v3  ;;  %v275_v4 = vadd.f32 %v271_v56, %v211_v14  ;;  %v584_v52 = vld [vmem:[#allocation5 + $0x30] sm:$0xf]  ;;  %v585_v53 = vld [vmem:[#allocation5 + $0x34] sm:$0xf] }
  0x40   :  { %v451_v7 = vmul.f32 %v401_v50, %v2210_v54  ;;  %v452_v8 = vmul.f32 %v402_v57, %v2213_v55  ;;  %v453_v9 = vmul.f32 %v403_v58, %v2218_v0  ;;  %v454_v10 = vmul.f32 -1.0, %v450_v62  ;;  %v586_v56 = vld [vmem:[#allocation5 + $0x38] sm:$0xf] }
  0x41   :  { %v276_v13 = vadd.f32 %v272_v63, %v212_v16  ;;  %v277_v17 = vadd.f32 %v273_v1, %v213_v31  ;;  %v279_v18 = vsel %vm278_vm0, %v274_v2, 0.0  ;;  %v280_v19 = vsel %vm278_vm0, %v275_v4, 0.0  ;;  %v531_v16 = vld [vmem:[#allocation5 + $0x24] sm:$0xf]  ;;  %v532_v31 = vld [vmem:[#allocation5 + $0x28] sm:$0xf] }
  0x42   :  { %v281_v26 = vadd.f32 %v280_v19, %v279_v18  ;;  %v455_v3 = vmul.f32 -1.0, %v451_v7  ;;  %v456_v14 = vmul.f32 -1.0, %v452_v8  ;;  %v457_v27 = vmul.f32 -1.0, %v453_v9  ;;  %v642_v2 = vld [vmem:[#allocation5] sm:$0xf] }
  0x43   :  { %v282_v32 = vsel %vm278_vm0, %v276_v13, 0.0  ;;  %v284_v33 = vsel %vm278_vm0, %v277_v17, 0.0  ;;  %v458_v34 = vadd.f32 %v454_v10, %v396_v49  ;;  %v512_v35 = vmul.f32 %v462_v11, %v2228_v24  ;;  %v643_v4 = vld [vmem:[#allocation5 + $0x4] sm:$0xf]  ;;  %v644_v11 = vld [vmem:[#allocation5 + $0x8] sm:$0xf] }
  0x44   :  { %v283_v36 = vadd.f32 %v282_v32, %v281_v26  ;;  %v459_v41 = vadd.f32 %v455_v3, %v397_v59  ;;  %v460_v42 = vadd.f32 %v456_v14, %v398_v60  ;;  %v461_v43 = vadd.f32 %v457_v27, %v399_v61  ;;  %v587_v60 = vld [vmem:[#allocation5 + $0x3c] sm:$0xf]  ;;  %v700_v13 = vld [vmem:[#allocation5 + $0x10] sm:$0xf] }
  0x45   :  { %v513_v46 = vmul.f32 %v463_v12, %v2231_v25  ;;  %v514_v48 = vmul.f32 %v464_v20, %v2237_v39  ;;  %v515_v50 = vmul.f32 %v465_v23, %v2240_v40  ;;  %v516_v51 = vadd.f32 %v512_v35, %v458_v34  ;;  %v645_v12 = vld [vmem:[#allocation5 + $0xc] sm:$0xf]  ;;  %v701_v23 = vld [vmem:[#allocation5 + $0x14] sm:$0xf] }
  0x46   :  { %v285_v49 = vadd.f32 %v284_v33, %v283_v36  ;;  %v580_v57 = vmul.f32 %v530_v29, %v2172_v15  ;;  %v581_v58 = vmul.f32 %v531_v16, %v2176_v21  ;;  %v582_v59 = vmul.f32 %v532_v31, %v2179_v22  ;;  %v702_v29 = vld [vmem:[#allocation5 + $0x18] sm:$0xf]  ;;  %v703_v16 = vld [vmem:[#allocation5 + $0x1c] sm:$0xf] }
  0x47   :  { %v517_v61 = vadd.f32 %v513_v46, %v459_v41  ;;  %v518_v62 = vadd.f32 %v514_v48, %v460_v42  ;;  %v519_v63 = vadd.f32 %v515_v50, %v461_v43  ;;  %v520_v1 = vsel %vm278_vm0, %v516_v51, 0.0  ;;  %v772_v43 = vld [vmem:[#allocation5 + $0x30] sm:$0xf] }
  0x48   :  { %287 = vst [vmem:[#allocation7] sm:$0xf] %v285_v49  ;;  %v583_v7 = vmul.f32 %v533_v44, %v2187_v30  ;;  %v634_v8 = vmul.f32 %v584_v52, %v2184_v28  ;;  %v635_v9 = vmul.f32 %v585_v53, %v2193_v37  ;;  %v636_v10 = vmul.f32 %v586_v56, %v2196_v38  ;;  %v773_v44 = vld [vmem:[#allocation5 + $0x34] sm:$0xf]  ;;  %v774_v52 = vld [vmem:[#allocation5 + $0x38] sm:$0xf] }
  0x49   :  { %v521_v17 = vsel %vm278_vm0, %v517_v61, 0.0  ;;  %v523_v18 = vsel %vm278_vm0, %v518_v62, 0.0  ;;  %v525_v19 = vsel %vm278_vm0, %v519_v63, 0.0  ;;  %v637_v20 = vmul.f32 %v587_v60, %v2205_v47  ;;  %v775_v53 = vld [vmem:[#allocation5 + $0x3c] sm:$0xf] }
  0x4a   :  { %v522_v26 = vadd.f32 %v521_v17, %v520_v1  ;;  %v638_v3 = vadd.f32 %v634_v8, %v580_v57  ;;  %v639_v14 = vadd.f32 %v635_v9, %v581_v58  ;;  %v640_v27 = vadd.f32 %v636_v10, %v582_v59  ;;  %v826_v59 = vld [vmem:[#allocation5 + $0x20] sm:$0xf]  ;;  %v827_v60 = vld [vmem:[#allocation5 + $0x24] sm:$0xf] }
  0x4b   :  { %v641_v32 = vadd.f32 %v637_v20, %v583_v7  ;;  %v692_v33 = vmul.f32 %v642_v2, %v2202_v45  ;;  %v693_v34 = vmul.f32 %v643_v4, %v2210_v54  ;;  %v694_v35 = vmul.f32 %v644_v11, %v2213_v55  ;;  %v828_v2 = vld [vmem:[#allocation5 + $0x28] sm:$0xf]  ;;  %v829_v4 = vld [vmem:[#allocation5 + $0x2c] sm:$0xf] }
  0x4c   :  { %v524_v31 = vadd.f32 %v523_v18, %v522_v26  ;;  %v695_v36 = vmul.f32 %v645_v12, %v2218_v0  ;;  %v750_v41 = vmul.f32 %v700_v13, %v2228_v24  ;;  %v751_v42 = vmul.f32 %v701_v23, %v2231_v25  ;;  %v884_v18 = vld [vmem:[#allocation5 + $0x10] sm:$0xf] }
  0x4d   :  { %v696_v46 = vadd.f32 %v692_v33, %v638_v3  ;;  %v697_v48 = vadd.f32 %v693_v34, %v639_v14  ;;  %v698_v50 = vadd.f32 %v694_v35, %v640_v27  ;;  %v752_v51 = vmul.f32 %v702_v29, %v2237_v39  ;;  %v887_v3 = vld [vmem:[#allocation5 + $0x1c] sm:$0xf]  ;;  %v947_v29 = vld [vmem:[#allocation5 + $0x4] sm:$0xf] }
  0x4e   :  { %v526_v56 = vadd.f32 %v525_v19, %v524_v31  ;;  %v699_v49 = vadd.f32 %v695_v36, %v641_v32  ;;  %v753_v57 = vmul.f32 %v703_v16, %v2240_v40  ;;  %v754_v58 = vmul.f32 -1.0, %v750_v41  ;;  %v885_v19 = vld [vmem:[#allocation5 + $0x14] sm:$0xf]  ;;  %v949_v36 = vld [vmem:[#allocation5 + $0xc] sm:$0xf] }
  0x4f   :  { %v755_v61 = vmul.f32 -1.0, %v751_v42  ;;  %v756_v62 = vmul.f32 -1.0, %v752_v51  ;;  %v822_v63 = vmul.f32 %v772_v43, %v2172_v15  ;;  %v823_v1 = vmul.f32 %v773_v44, %v2176_v21  ;;  %v886_v15 = vld [vmem:[#allocation5 + $0x18] sm:$0xf] }
  0x50   :  { %529 = vst [vmem:[#allocation7 + $0x4] sm:$0xf] %v526_v56  ;;  %v757_v7 = vmul.f32 -1.0, %v753_v57  ;;  %v758_v8 = vadd.f32 %v754_v58, %v696_v46  ;;  %v824_v9 = vmul.f32 %v774_v52, %v2179_v22  ;;  %v825_v10 = vmul.f32 %v775_v53, %v2187_v30  ;;  %v946_v22 = vld [vmem:[#allocation5] sm:$0xf] }
  0x51   :  { %v759_v11 = vadd.f32 %v755_v61, %v697_v48  ;;  %v760_v12 = vadd.f32 %v756_v62, %v698_v50  ;;  %v876_v13 = vmul.f32 %v826_v59, %v2184_v28  ;;  %v877_v17 = vmul.f32 %v827_v60, %v2193_v37  ;;  %v948_v37 = vld [vmem:[#allocation5 + $0x8] sm:$0xf]  ;;  %v2020_v41 = vld.sshfl [vmem:[#allocation2 + $0x10] sm:$0x33 pattern:$0x75316420] }
  0x52   :  { %v761_v20 = vadd.f32 %v757_v7, %v699_v49  ;;  %v762_v21 = vsel %vm278_vm0, %v758_v8, 0.0  ;;  %v878_v23 = vmul.f32 %v828_v2, %v2196_v38  ;;  %v879_v26 = vmul.f32 %v829_v4, %v2205_v47  ;;  %v2021_v48 = vld.sshfl [vmem:[#allocation2 + $0x14] sm:$0x33 pattern:$0x75316420] }
  0x53   :  { %v763_v30 = vsel %vm278_vm0, %v759_v11, 0.0  ;;  %v765_v14 = vsel %vm278_vm0, %v760_v12, 0.0  ;;  %v880_v27 = vadd.f32 %v876_v13, %v822_v63  ;;  %v881_v28 = vadd.f32 %v877_v17, %v823_v1  ;;  %v1016_v2 = vld [vmem:[#allocation5 + $0x8] sm:$0xf] }
  0x54   :  { %v764_v32 = vadd.f32 %v763_v30, %v762_v21  ;;  %v767_v33 = vsel %vm278_vm0, %v761_v20, 0.0  ;;  %v882_v34 = vadd.f32 %v878_v23, %v824_v9  ;;  %v883_v35 = vadd.f32 %v879_v26, %v825_v10  ;;  %v2022_v4 = vld.sshfl [vmem:[#allocation2 + $0x18] sm:$0x33 pattern:$0x75316420] }
  0x55   :  { %v934_v16 = vmul.f32 %v884_v18, %v2202_v45  ;;  %v935_v38 = vmul.f32 %v885_v19, %v2210_v54  ;;  %v936_v47 = vmul.f32 %v886_v15, %v2213_v55  ;;  %v937_v31 = vmul.f32 %v887_v3, %v2218_v0  ;;  %v2023_v11 = vld.sshfl [vmem:[#allocation2 + $0x1c] sm:$0x33 pattern:$0x75316420]  ;;  %v1017_v19 = vld [vmem:[#allocation5 + $0xc] sm:$0xf] }
  0x56   :  { %v766_v42 = vadd.f32 %v765_v14, %v764_v32  ;;  %v996_v43 = vmul.f32 %v946_v22, %v2228_v24  ;;  %v997_v44 = vmul.f32 %v947_v29, %v2231_v25  ;;  %v998_v46 = vmul.f32 %v948_v37, %v2237_v39  ;;  %v1014_v24 = vld [vmem:[#allocation5] sm:$0xf]  ;;  %v1015_v25 = vld [vmem:[#allocation5 + $0x4] sm:$0xf]  ;;  %v1070_v29 = vld [vmem:[#allocation5 + $0x14] sm:$0xf] }
  0x57   :  { %v938_v50 = vmul.f32 -1.0, %v934_v16  ;;  %v939_v51 = vmul.f32 -1.0, %v935_v38  ;;  %v940_v52 = vmul.f32 -1.0, %v936_v47  ;;  %v941_v45 = vmul.f32 -1.0, %v937_v31  ;;  %v1128_v38 = vld [vmem:[#allocation5 + $0x20] sm:$0xf] }
  0x58   :  { %v768_v53 = vadd.f32 %v767_v33, %v766_v42  ;;  %v999_v54 = vmul.f32 %v949_v36, %v2240_v40  ;;  %v1028_v55 = vcombine.high %v2020_v41, %v2020_v41  ;;  %v1035_v0 = vrot.slane %v2020_v41, %v2165_v5  ;;  %v1071_v31 = vld [vmem:[#allocation5 + $0x18] sm:$0xf]  ;;  %v1072_v36 = vld [vmem:[#allocation5 + $0x1c] sm:$0xf] }
  0x59   :  { %v942_v56 = vadd.f32 %v938_v50, %v880_v27  ;;  %v943_v49 = vadd.f32 %v939_v51, %v881_v28  ;;  %v944_v57 = vadd.f32 %v940_v52, %v882_v34  ;;  %v945_v58 = vadd.f32 %v941_v45, %v883_v35  ;;  %v1069_v28 = vld [vmem:[#allocation5 + $0x10] sm:$0xf]  ;;  %v1129_v51 = vld [vmem:[#allocation5 + $0x24] sm:$0xf]  ;;  %v1130_v52 = vld [vmem:[#allocation5 + $0x28] sm:$0xf] }
  0x5a   :  { %771 = vst [vmem:[#allocation7 + $0x8] sm:$0xf] %v768_v53  ;;  %v1042_v39 = vrot.slane %v1028_v55, %v2165_v5  ;;  %v1043_v59 = vcombine.high %v1035_v0, %v1035_v0  ;;  %v2304_v60 = vrot.slane %v1035_v0, %v2167_v6  ;;  %v1083_v61 = vcombine.high %v2021_v48, %v2021_v48 }
  0x5b   :  { %v1000_v62 = vadd.f32 %v996_v43, %v942_v56  ;;  %v1001_v63 = vadd.f32 %v997_v44, %v943_v49  ;;  %v1002_v40 = vadd.f32 %v998_v46, %v944_v57  ;;  %v1003_v1 = vadd.f32 %v999_v54, %v945_v58  ;;  %v1131_v58 = vld [vmem:[#allocation5 + $0x2c] sm:$0xf] }
  0x5c   :  { %v1044_v7 = vcombine.high %v1042_v39, %v1042_v39  ;;  %v2307_v8 = vrot.slane %v1042_v39, %v2167_v6  ;;  %v2310_v9 = vrot.slane %v1043_v59, %v2167_v6  ;;  %v1065_v10 = vmul.f32 %v2304_v60, %v1014_v24 }
  0x5d   :  { %v1004_v12 = vsel %vm278_vm0, %v1000_v62, 0.0  ;;  %v1005_v13 = vsel %vm278_vm0, %v1001_v63, 0.0  ;;  %v1007_v17 = vsel %vm278_vm0, %v1002_v40, 0.0  ;;  %v1009_v18 = vsel %vm278_vm0, %v1003_v1, 0.0  ;;  %v1187_v1 = vld [vmem:[#allocation5 + $0x30] sm:$0xf] }
  0x5e   :  { %v1006_v15 = vadd.f32 %v1005_v13, %v1004_v12  ;;  %v2318_v20 = vrot.slane %v1044_v7, %v2167_v6  ;;  %v1066_v21 = vmul.f32 %v2307_v8, %v1015_v25  ;;  %v1067_v23 = vmul.f32 %v2310_v9, %v1016_v2  ;;  %v1188_v2 = vld [vmem:[#allocation5 + $0x34] sm:$0xf]  ;;  %v1189_v12 = vld [vmem:[#allocation5 + $0x38] sm:$0xf] }
  0x5f   :  { %v1090_v26 = vrot.slane %v2021_v48, %v2165_v5  ;;  %v1097_v3 = vrot.slane %v1083_v61, %v2165_v5  ;;  %v1142_v22 = vcombine.high %v2022_v4, %v2022_v4  ;;  %v1149_v30 = vrot.slane %v2022_v4, %v2165_v5  ;;  %v1260_v61 = vld [vmem:[#allocation5 + $0x10] sm:$0xf]  ;;  %v1261_v7 = vld [vmem:[#allocation5 + $0x14] sm:$0xf] }
  0x60   :  { %v1008_v14 = vadd.f32 %v1007_v17, %v1006_v15  ;;  %v1068_v27 = vmul.f32 %v2318_v20, %v1017_v19  ;;  %v1201_v37 = vcombine.high %v2023_v11, %v2023_v11  ;;  %v1208_v32 = vrot.slane %v2023_v11, %v2165_v5  ;;  %v1263_v19 = vld [vmem:[#allocation5 + $0x1c] sm:$0xf] }
  0x61   :  { %v1098_v33 = vcombine.high %v1090_v26, %v1090_v26  ;;  %v1099_v34 = vcombine.high %v1097_v3, %v1097_v3  ;;  %v2328_v35 = vrot.slane %v1090_v26, %v2167_v6  ;;  %v2331_v16 = vrot.slane %v1097_v3, %v2167_v6  ;;  %v1314_v3 = vld [vmem:[#allocation5] sm:$0xf] }
  0x62   :  { %v1010_v47 = vadd.f32 %v1009_v18, %v1008_v14  ;;  %v1156_v41 = vrot.slane %v1142_v22, %v2165_v5  ;;  %v1157_v42 = vcombine.high %v1149_v30, %v1149_v30  ;;  %v2335_v43 = vrot.slane %v1149_v30, %v2167_v6  ;;  %v1262_v18 = vld [vmem:[#allocation5 + $0x18] sm:$0xf]  ;;  %v1315_v22 = vld [vmem:[#allocation5 + $0x4] sm:$0xf] }
  0x63   :  { %v2338_v44 = vrot.slane %v1098_v33, %v2167_v6  ;;  %v2341_v46 = vrot.slane %v1099_v34, %v2167_v6  ;;  %v1120_v48 = vmul.f32 %v2328_v35, %v1069_v28  ;;  %v1121_v50 = vmul.f32 %v2331_v16, %v1070_v29  ;;  %v1316_v29 = vld [vmem:[#allocation5 + $0x8] sm:$0xf] }
  0x64   :  { %1013 = vst [vmem:[#allocation7 + $0xc] sm:$0xf] %v1010_v47  ;;  %v1158_v45 = vcombine.high %v1156_v41, %v1156_v41  ;;  %v2346_v53 = vrot.slane %v1156_v41, %v2167_v6  ;;  %v2349_v54 = vrot.slane %v1157_v42, %v2167_v6  ;;  %v1179_v55 = vmul.f32 %v2335_v43, %v1128_v38 }
  0x65   :  { %v1122_v0 = vmul.f32 %v2338_v44, %v1071_v31  ;;  %v1123_v56 = vmul.f32 %v2341_v46, %v1072_v36  ;;  %v1124_v49 = vadd.f32 %v1120_v48, %v1065_v10  ;;  %v1125_v57 = vadd.f32 %v1121_v50, %v1066_v21 }
  0x66   :  { %v2355_v24 = vrot.slane %v1158_v45, %v2167_v6  ;;  %v1180_v25 = vmul.f32 %v2346_v53, %v1129_v51  ;;  %v1181_v39 = vmul.f32 %v2349_v54, %v1130_v52  ;;  %v1215_v59 = vrot.slane %v1201_v37, %v2165_v5  ;;  %v1190_v5 = vld [vmem:[#allocation5 + $0x3c] sm:$0xf]  ;;  %v1317_v37 = vld [vmem:[#allocation5 + $0xc] sm:$0xf]  ;;  %v1372_v51 = vld [vmem:[#allocation5 + $0x30] sm:$0xf] }
  0x67   :  { %v1126_v62 = vadd.f32 %v1122_v0, %v1067_v23  ;;  %v1127_v63 = vadd.f32 %v1123_v56, %v1068_v27  ;;  %v1183_v40 = vadd.f32 %v1179_v55, %v1124_v49  ;;  %v1216_v4 = vcombine.high %v1208_v32, %v1208_v32  ;;  %v1373_v52 = vld [vmem:[#allocation5 + $0x34] sm:$0xf]  ;;  %v1374_v49 = vld [vmem:[#allocation5 + $0x38] sm:$0xf] }
  0x68   :  { %v1182_v10 = vmul.f32 %v2355_v24, %v1131_v58  ;;  %v1184_v11 = vadd.f32 %v1180_v25, %v1125_v57  ;;  %v1217_v13 = vcombine.high %v1215_v59, %v1215_v59  ;;  %v2362_v17 = vrot.slane %v1208_v32, %v2167_v6  ;;  %v1375_v57 = vld [vmem:[#allocation5 + $0x3c] sm:$0xf] }
  0x69   :  { %v1185_v15 = vadd.f32 %v1181_v39, %v1126_v62  ;;  %v2365_v21 = vrot.slane %v1215_v59, %v2167_v6  ;;  %v2368_v23 = vrot.slane %v1216_v4, %v2167_v6  ;;  %v1310_v26 = vmul.f32 %v1260_v61, %v2304_v60  ;;  %v1435_v4 = vld [vmem:[#allocation5 + $0x24] sm:$0xf] }
  0x6a   :  { %v1186_v30 = vadd.f32 %v1182_v10, %v1127_v63  ;;  %v2372_v14 = vrot.slane %v1217_v13, %v2167_v6  ;;  %v1238_v27 = vmul.f32 %v2362_v17, %v1187_v1  ;;  %v1311_v28 = vmul.f32 %v1261_v7, %v2307_v8  ;;  %v1437_v13 = vld [vmem:[#allocation5 + $0x2c] sm:$0xf] }
  0x6b   :  { %v1239_v32 = vmul.f32 %v2365_v21, %v1188_v2  ;;  %v1240_v33 = vmul.f32 %v2368_v23, %v1189_v12  ;;  %v1312_v34 = vmul.f32 %v1262_v18, %v2310_v9  ;;  %v1313_v38 = vmul.f32 %v1263_v19, %v2318_v20  ;;  %v1434_v2 = vld [vmem:[#allocation5 + $0x20] sm:$0xf]  ;;  %v1436_v12 = vld [vmem:[#allocation5 + $0x28] sm:$0xf] }
  0x6c   :  { %v1241_v47 = vmul.f32 %v2372_v14, %v1190_v5  ;;  %v1242_v31 = vmul.f32 -1.0, %v1238_v27  ;;  %v1364_v6 = vmul.f32 %v1314_v3, %v2328_v35  ;;  %v1365_v36 = vmul.f32 %v1315_v22, %v2331_v16 }
  0x6d   :  { %v1243_v41 = vmul.f32 -1.0, %v1239_v32  ;;  %v1244_v42 = vmul.f32 -1.0, %v1240_v33  ;;  %v1366_v48 = vmul.f32 %v1316_v29, %v2338_v44  ;;  %v1367_v50 = vmul.f32 %v1317_v37, %v2341_v46 }
  0x6e   :  { %v1245_v45 = vmul.f32 -1.0, %v1241_v47  ;;  %v1246_v55 = vadd.f32 %v1242_v31, %v1183_v40  ;;  %v1368_v0 = vadd.f32 %v1364_v6, %v1310_v26  ;;  %v1369_v56 = vadd.f32 %v1365_v36, %v1311_v28  ;;  %v1502_v26 = vld [vmem:[#allocation5 + $0x20] sm:$0xf]  ;;  %v1503_v28 = vld [vmem:[#allocation5 + $0x24] sm:$0xf] }
  0x6f   :  { %v1247_v58 = vadd.f32 %v1243_v41, %v1184_v11  ;;  %v1248_v25 = vadd.f32 %v1244_v42, %v1185_v15  ;;  %v1370_v39 = vadd.f32 %v1366_v48, %v1312_v34  ;;  %v1371_v59 = vadd.f32 %v1367_v50, %v1313_v38  ;;  %v1504_v34 = vld [vmem:[#allocation5 + $0x28] sm:$0xf]  ;;  %v1505_v38 = vld [vmem:[#allocation5 + $0x2c] sm:$0xf]  ;;  %v1556_v41 = vld [vmem:[#allocation5 + $0x30] sm:$0xf] }
  0x70   :  { %v1249_v61 = vadd.f32 %v1245_v45, %v1186_v30  ;;  %v1250_v62 = vsel %vm278_vm0, %v1246_v55, 0.0  ;;  %v1422_v63 = vmul.f32 %v1372_v51, %v2335_v43  ;;  %v1423_v1 = vmul.f32 %v1373_v52, %v2346_v53  ;;  %v1557_v42 = vld [vmem:[#allocation5 + $0x34] sm:$0xf]  ;;  %v1558_v45 = vld [vmem:[#allocation5 + $0x38] sm:$0xf] }
  0x71   :  { %v1251_v7 = vsel %vm278_vm0, %v1247_v58, 0.0  ;;  %v1253_v40 = vsel %vm278_vm0, %v1248_v25, 0.0  ;;  %v1424_v10 = vmul.f32 %v1374_v49, %v2349_v54  ;;  %v1425_v11 = vmul.f32 %v1375_v57, %v2355_v24  ;;  %v1559_v57 = vld [vmem:[#allocation5 + $0x3c] sm:$0xf]  ;;  %v1614_v58 = vld [vmem:[#allocation5] sm:$0xf] }
  0x72   :  { %v1252_v18 = vadd.f32 %v1251_v7, %v1250_v62  ;;  %v1255_v19 = vsel %vm278_vm0, %v1249_v61, 0.0  ;;  %v1426_v15 = vmul.f32 -1.0, %v1422_v63  ;;  %v1427_v5 = vmul.f32 -1.0, %v1423_v1  ;;  %v1615_v62 = vld [vmem:[#allocation5 + $0x4] sm:$0xf] }
  0x73   :  { %v1428_v3 = vmul.f32 -1.0, %v1424_v10  ;;  %v1429_v22 = vmul.f32 -1.0, %v1425_v11  ;;  %v1484_v30 = vmul.f32 %v1434_v2, %v2362_v17  ;;  %v1485_v27 = vmul.f32 %v1435_v4, %v2365_v21  ;;  %v1616_v63 = vld [vmem:[#allocation5 + $0x8] sm:$0xf]  ;;  %v1672_v10 = vld [vmem:[#allocation5 + $0x10] sm:$0xf] }
  0x74   :  { %v1254_v29 = vadd.f32 %v1253_v40, %v1252_v18  ;;  %v1430_v37 = vadd.f32 %v1426_v15, %v1368_v0  ;;  %v1431_v32 = vadd.f32 %v1427_v5, %v1369_v56  ;;  %v1486_v33 = vmul.f32 %v1436_v12, %v2368_v23  ;;  %v1617_v40 = vld [vmem:[#allocation5 + $0xc] sm:$0xf] }
  0x75   :  { %v1432_v47 = vadd.f32 %v1428_v3, %v1370_v39  ;;  %v1433_v31 = vadd.f32 %v1429_v22, %v1371_v59  ;;  %v1487_v6 = vmul.f32 %v1437_v13, %v2372_v14  ;;  %v1552_v36 = vmul.f32 %v1502_v26, %v2304_v60  ;;  %v1674_v22 = vld [vmem:[#allocation5 + $0x18] sm:$0xf] }
  0x76   :  { %v1256_v48 = vadd.f32 %v1255_v19, %v1254_v29  ;;  %v1488_v50 = vadd.f32 %v1484_v30, %v1430_v37  ;;  %v1489_v51 = vadd.f32 %v1485_v27, %v1431_v32  ;;  %v1553_v52 = vmul.f32 %v1503_v28, %v2307_v8  ;;  %v1673_v19 = vld [vmem:[#allocation5 + $0x14] sm:$0xf]  ;;  %v1675_v30 = vld [vmem:[#allocation5 + $0x1c] sm:$0xf]  ;;  %v1744_v32 = vld [vmem:[#allocation5 + $0x30] sm:$0xf] }
  0x77   :  { %v1490_v55 = vadd.f32 %v1486_v33, %v1432_v47  ;;  %v1491_v0 = vadd.f32 %v1487_v6, %v1433_v31  ;;  %v1554_v56 = vmul.f32 %v1504_v34, %v2310_v9  ;;  %v1555_v49 = vmul.f32 %v1505_v38, %v2318_v20  ;;  %v1745_v33 = vld [vmem:[#allocation5 + $0x34] sm:$0xf]  ;;  %v1746_v34 = vld [vmem:[#allocation5 + $0x38] sm:$0xf] }
  0x78   :  { %1259 = vst [vmem:[#allocation7 + $0x10] sm:$0xf] %v1256_v48  ;;  %v1492_v25 = vsel %vm278_vm0, %v1488_v50, 0.0  ;;  %v1493_v39 = vsel %vm278_vm0, %v1489_v51, 0.0  ;;  %v1606_v59 = vmul.f32 %v1556_v41, %v2328_v35  ;;  %v1607_v61 = vmul.f32 %v1557_v42, %v2331_v16  ;;  %v1798_v41 = vld [vmem:[#allocation5 + $0x20] sm:$0xf] }
  0x79   :  { %v1494_v1 = vadd.f32 %v1493_v39, %v1492_v25  ;;  %v1495_v2 = vsel %vm278_vm0, %v1490_v55, 0.0  ;;  %v1497_v4 = vsel %vm278_vm0, %v1491_v0, 0.0  ;;  %v1608_v7 = vmul.f32 %v1558_v45, %v2338_v44  ;;  %v1800_v45 = vld [vmem:[#allocation5 + $0x28] sm:$0xf] }
  0x7a   :  { %v1609_v11 = vmul.f32 %v1559_v57, %v2341_v46  ;;  %v1610_v12 = vadd.f32 %v1606_v59, %v1552_v36  ;;  %v1611_v13 = vadd.f32 %v1607_v61, %v1553_v52  ;;  %v1664_v18 = vmul.f32 %v1614_v58, %v2335_v43  ;;  %v1747_v36 = vld [vmem:[#allocation5 + $0x3c] sm:$0xf]  ;;  %v1799_v52 = vld [vmem:[#allocation5 + $0x24] sm:$0xf]  ;;  %v1801_v57 = vld [vmem:[#allocation5 + $0x2c] sm:$0xf] }
  0x7b   :  { %v1496_v15 = vadd.f32 %v1495_v2, %v1494_v1  ;;  %v1612_v5 = vadd.f32 %v1608_v7, %v1554_v56  ;;  %v1665_v26 = vmul.f32 %v1615_v62, %v2346_v53  ;;  %v1666_v3 = vmul.f32 %v1616_v63, %v2349_v54  ;;  %v1856_v2 = vld [vmem:[#allocation5 + $0x10] sm:$0xf] }
  0x7c   :  { %v1613_v27 = vadd.f32 %v1609_v11, %v1555_v49  ;;  %v1667_v28 = vmul.f32 %v1617_v40, %v2355_v24  ;;  %v1668_v29 = vadd.f32 %v1664_v18, %v1610_v12  ;;  %v1722_v37 = vmul.f32 %v1672_v10, %v2362_v17  ;;  %v1859_v10 = vld [vmem:[#allocation5 + $0x1c] sm:$0xf]  ;;  %v1918_v11 = vld [vmem:[#allocation5] sm:$0xf]  ;;  %v1919_v18 = vld [vmem:[#allocation5 + $0x4] sm:$0xf] }
  0x7d   :  { %v1498_v38 = vadd.f32 %v1497_v4, %v1496_v15  ;;  %v1669_v47 = vadd.f32 %v1665_v26, %v1611_v13  ;;  %v1670_v31 = vadd.f32 %v1666_v3, %v1612_v5  ;;  %v1723_v6 = vmul.f32 %v1673_v19, %v2365_v21  ;;  %v1857_v4 = vld [vmem:[#allocation5 + $0x14] sm:$0xf] }
  0x7e   :  { %v1671_v42 = vadd.f32 %v1667_v28, %v1613_v27  ;;  %v1724_v48 = vmul.f32 %v1674_v22, %v2368_v23  ;;  %v1725_v50 = vmul.f32 %v1675_v30, %v2372_v14  ;;  %v1726_v51 = vmul.f32 -1.0, %v1722_v37  ;;  %v1921_v30 = vld [vmem:[#allocation5 + $0xc] sm:$0xf] }
  0x7f   :  { %1501 = vst [vmem:[#allocation7 + $0x14] sm:$0xf] %v1498_v38  ;;  %v1727_v55 = vmul.f32 -1.0, %v1723_v6  ;;  %v1794_v0 = vmul.f32 %v1744_v32, %v2304_v60  ;;  %v1795_v56 = vmul.f32 %v1745_v33, %v2307_v8  ;;  %v1796_v49 = vmul.f32 %v1746_v34, %v2310_v9  ;;  %v1858_v60 = vld [vmem:[#allocation5 + $0x18] sm:$0xf] }
  0x80   :  { %v1728_v58 = vmul.f32 -1.0, %v1724_v48  ;;  %v1729_v25 = vmul.f32 -1.0, %v1725_v50  ;;  %v1730_v39 = vadd.f32 %v1726_v51, %v1668_v29  ;;  %v1797_v59 = vmul.f32 %v1747_v36, %v2318_v20 }
  0x81   :  { %v1731_v61 = vadd.f32 %v1727_v55, %v1669_v47  ;;  %v1848_v62 = vmul.f32 %v1798_v41, %v2328_v35  ;;  %v1849_v63 = vmul.f32 %v1799_v52, %v2331_v16  ;;  %v1850_v1 = vmul.f32 %v1800_v45, %v2338_v44  ;;  %v1920_v16 = vld [vmem:[#allocation5 + $0x8] sm:$0xf] }
  0x82   :  { %v1732_v7 = vadd.f32 %v1728_v58, %v1670_v31  ;;  %v1733_v8 = vadd.f32 %v1729_v25, %v1671_v42  ;;  %v1734_v9 = vsel %vm278_vm0, %v1730_v39, 0.0  ;;  %v1851_v40 = vmul.f32 %v1801_v57, %v2341_v46 }
  0x83   :  { %v1735_v20 = vsel %vm278_vm0, %v1731_v61, 0.0  ;;  %v1852_v12 = vadd.f32 %v1848_v62, %v1794_v0  ;;  %v1853_v13 = vadd.f32 %v1849_v63, %v1795_v56  ;;  %v1854_v35 = vadd.f32 %v1850_v1, %v1796_v49 }
  0x84   :  { %v1736_v19 = vadd.f32 %v1735_v20, %v1734_v9  ;;  %v1737_v44 = vsel %vm278_vm0, %v1732_v7, 0.0  ;;  %v1739_v15 = vsel %vm278_vm0, %v1733_v8, 0.0  ;;  %v1855_v5 = vadd.f32 %v1851_v40, %v1797_v59 }
  0x85   :  { %v1906_v26 = vmul.f32 %v1856_v2, %v2335_v43  ;;  %v1907_v3 = vmul.f32 %v1857_v4, %v2346_v53  ;;  %v1908_v46 = vmul.f32 %v1858_v60, %v2349_v54  ;;  %v1909_v22 = vmul.f32 %v1859_v10, %v2355_v24 }
  0x86   :  { %v1738_v27 = vadd.f32 %v1737_v44, %v1736_v19  ;;  %v1968_v28 = vmul.f32 %v1918_v11, %v2362_v17  ;;  %v1969_v29 = vmul.f32 %v1919_v18, %v2365_v21  ;;  %v1970_v37 = vmul.f32 %v1920_v16, %v2368_v23 }
  0x87   :  { %v1910_v32 = vmul.f32 -1.0, %v1906_v26  ;;  %v1911_v33 = vmul.f32 -1.0, %v1907_v3  ;;  %v1912_v34 = vmul.f32 -1.0, %v1908_v46  ;;  %v1913_v38 = vmul.f32 -1.0, %v1909_v22 }
  0x88   :  { %v1740_v47 = vadd.f32 %v1739_v15, %v1738_v27  ;;  %v1971_v43 = vmul.f32 %v1921_v30, %v2372_v14 }
  0x89   :  { %v1914_v53 = vadd.f32 %v1910_v32, %v1852_v12  ;;  %v1915_v31 = vadd.f32 %v1911_v33, %v1853_v13  ;;  %v1916_v54 = vadd.f32 %v1912_v34, %v1854_v35  ;;  %v1917_v6 = vadd.f32 %v1913_v38, %v1855_v5 }
  0x8a   :  { %1743 = vst [vmem:[#allocation7 + $0x18] sm:$0xf] %v1740_v47 }
  0x8b   :  { %v1972_v24 = vadd.f32 %v1968_v28, %v1914_v53  ;;  %v1973_v36 = vadd.f32 %v1969_v29, %v1915_v31  ;;  %v1974_v41 = vadd.f32 %v1970_v37, %v1916_v54  ;;  %v1975_v17 = vadd.f32 %v1971_v43, %v1917_v6 }
  0x8d   :  { %v1976_v21 = vsel %vm278_vm0, %v1972_v24, 0.0  ;;  %v1977_v23 = vsel %vm278_vm0, %v1973_v36, 0.0  ;;  %v1979_v42 = vsel %vm278_vm0, %v1974_v41, 0.0  ;;  %v1981_v50 = vsel %vm278_vm0, %v1975_v17, 0.0 }
  0x8e   :  { %v1978_v48 = vadd.f32 %v1977_v23, %v1976_v21 }
  0x90   :  { %v1980_v14 = vadd.f32 %v1979_v42, %v1978_v48 }
  0x92   :  { %v1982_v51 = vadd.f32 %v1981_v50, %v1980_v14 }
  0x94   :  { %1985 = vst [vmem:[#allocation7 + $0x1c] sm:$0xf] %v1982_v51 }
  0x95   :  { %2097 = shalt.err (!%p2094_p6)
}
  0x96   :  { %s2098_s10 = scalar_lea.hbm %s2458_s2, 512 }
  0x97   :  { %p2099_p7 = scmp.ne.s32.totalorder %s2458_s2, %s2098_s10  ;;  %p2102_p8 = scmp.lt.u32.totalorder %s2098_s10, %s2458_s2 }
  0x99   :  { %p2104_p9 = pnand %p2102_p8, %p2099_p7 }
  0x9b   :  { %2107 = shalt.err (!%p2104_p9)
}
  0x9c   :  { %1997 = dma.vmem_to_hbm [thread:$0]  %s1992_s6, 512, %s2458_s2, [#allocation4], %s2115_s19, %s2115_s19, %s2116_s20  }
  0x9d   :  { %2112 = dma.done.wait [#allocation4], 512  }
  0x9e   :  { %2113 = vsyncadd [#allocation4], 4294966784 }
  0x9f   :  { %2001 = vsyncpa [#allocation3], 1 }
  0xa0   :  { %2002 = vsyncpa [#allocation6], 1 }
  0xa1   :  { %2003 = vsyncpa [#allocation4], 1 }

</bundles_post_ra>
